<compile_context>
chip_gen: v7x
topology: tpu7x:2x2x1
jax: 0.10.0
libtpu: 0.0.40
codegen_flags: <defaults>
</compile_context>

<pallas_src>
import functools
import math

import jax
import jax.numpy as jnp
from jax.experimental import pallas as pl
from jax.experimental.pallas import tpu as pltpu


def _layernorm(x, gamma, beta, eps):
    # Matches the module's custom LayerNorm exactly:
    #   mean over last dim, *unbiased* std (divide by N-1), eps added to std.
    mean = jnp.mean(x, axis=-1, keepdims=True)
    var = jnp.sum((x - mean) ** 2, axis=-1, keepdims=True) / (x.shape[-1] - 1)
    std = jnp.sqrt(var)
    return gamma * (x - mean) / (std + eps) + beta


def encoder_layer_kernel(x_ref, mask_ref,
                         a1_ref, c1_ref, a2_ref, c2_ref,
                         wqkv_ref, bqkv_ref, wo_h_ref, bo_ref,
                         w1_ref, bf1_ref, w2_ref, bf2_ref,
                         o_ref,
                         *, num_heads, eps):
    Bb, S, D = x_ref.shape
    dk = D // num_heads
    scale = 1.0 / math.sqrt(dk)

    # Residual path in f32, flattened to [Bb*S, D] so matmuls see a tall M.
    x = x_ref[...].astype(jnp.float32).reshape(Bb * S, D)

    # ---- sublayer[0]: x + self_attn(LayerNorm(x)) ----
    h = _layernorm(x, a1_ref[0], c1_ref[0], eps)                 # [Bb*S, D] f32
    hb = h.astype(jnp.bfloat16)

    # Fused Q/K/V projection: one MXU pass, bf16 operands, f32 accumulation.
    qkv = jnp.dot(hb, wqkv_ref[...],
                  preferred_element_type=jnp.float32) + bqkv_ref[0]   # [Bb*S, 3D]
    q = (qkv[:, 0 * D:1 * D] * scale).astype(jnp.bfloat16)      # fold 1/sqrt(dk) once
    k = qkv[:, 1 * D:2 * D].astype(jnp.bfloat16)
    v = qkv[:, 2 * D:3 * D].astype(jnp.bfloat16)
    q = q.reshape(Bb, S, num_heads, dk)
    k = k.reshape(Bb, S, num_heads, dk)
    v = v.reshape(Bb, S, num_heads, dk)

    # Additive mask bias, computed once in f32.  (Exact 0/1 float mask assumed,
    # matching torch's `masked_fill(mask == 0, -1e9)`.)
    mask = mask_ref[...]                                         # [Bb, 1, S]
    bias = jnp.where(mask == 0, jnp.float32(-1e9), jnp.float32(0.0))

    wo_h = wo_h_ref[...]                                         # [H, dk, D] bf16

    attn_rows = []
    for b in range(Bb):                      # static unroll; Bb is small
        # All heads batched in a single einsum per stage (no per-head loop,
        # no dk-wide lane slices, no masked stores into scratch).
        s = jnp.einsum('qhd,khd->hqk', q[b], k[b],
                       preferred_element_type=jnp.float32)       # [H, S, S] f32
        s = s + bias[b][None, :, :]
        m = jnp.max(s, axis=-1, keepdims=True)
        p = jnp.exp(s - m)                                       # f32
        l = jnp.sum(p, axis=-1, keepdims=True)                   # [H, S, 1]
        ctx = jnp.einsum('hqk,khd->hqd', p.astype(jnp.bfloat16), v[b],
                         preferred_element_type=jnp.float32)     # [H, S, dk]
        # Deferred softmax normalization on the small context (EUP reciprocal).
        ctx = ctx * pl.reciprocal(l, approx=True)
        # Output projection per head (Wo pre-reshaped to [H, dk, D] on host),
        # summed over heads -> [S, D]; no transpose/reshape of the head axis.
        ob = jnp.einsum('hqd,hde->hqe', ctx.astype(jnp.bfloat16), wo_h,
                        preferred_element_type=jnp.float32)      # [H, S, D]
        attn_rows.append(jnp.sum(ob, axis=0))                    # [S, D]

    attn = jnp.concatenate(attn_rows, axis=0) + bo_ref[0]        # [Bb*S, D] f32
    x1 = x + attn                                                # residual 1

    # ---- sublayer[1]: x1 + feed_forward(LayerNorm(x1)) ----
    h2 = _layernorm(x1, a2_ref[0], c2_ref[0], eps).astype(jnp.bfloat16)
    ff = jnp.dot(h2, w1_ref[...], preferred_element_type=jnp.float32) + bf1_ref[0]
    ff = jnp.maximum(ff, 0.0).astype(jnp.bfloat16)               # bias+ReLU in f32, cast at dot
    ff = jnp.dot(ff, w2_ref[...], preferred_element_type=jnp.float32) + bf2_ref[0]

    o_ref[...] = (x1 + ff).reshape(Bb, S, D).astype(o_ref.dtype)


def _pick_block_b(B, S, target_rows=256):
    """Largest divisor of B such that block_b*S <= max(target_rows, S)."""
    best = 1
    for c in range(1, B + 1):
        if B % c == 0 and c * S <= max(target_rows, S):
            best = c
    return best


def encoder_layer(x, mask, params, *, num_heads=4, eps=1e-6, block_b=None):
    B, S, D = x.shape
    d_ff = params["w1"].shape[1]
    dk = D // num_heads

    bf16 = jnp.bfloat16
    # Fused QKV weight/bias; per-head-reshaped output projection weight.
    wqkv = jnp.concatenate([params["wq"], params["wk"], params["wv"]],
                           axis=1).astype(bf16)                  # [D, 3D]
    bqkv = jnp.concatenate([params["bq"], params["bk"], params["bv"]],
                           axis=1)                               # [1, 3D] f32
    wo_h = params["wo"].reshape(num_heads, dk, D).astype(bf16)   # [H, dk, D]
    w1 = params["w1"].astype(bf16)
    w2 = params["w2"].astype(bf16)

    if block_b is None:
        block_b = _pick_block_b(B, S)
    grid = (B // block_b,)

    def const_spec(shape):
        nd = len(shape)
        return pl.BlockSpec(shape, lambda i, _nd=nd: (0,) * _nd)

    # Advisory cost estimate so XLA can schedule surrounding ops sensibly.
    flops = 2 * B * S * (4 * D * D + 2 * S * D + 2 * D * d_ff)
    transcendentals = B * num_heads * S * S + 2 * B * S
    bytes_accessed = ((4 * D * D + 2 * D * d_ff) * 2            # bf16 weights
                      + (6 * D + d_ff) * 4                      # biases + LN params (f32)
                      + 2 * B * S * D * 4                       # x in + out (f32)
                      + B * S * 4)                              # mask
    cost = pl.CostEstimate(flops=int(flops),
                           transcendentals=int(transcendentals),
                           bytes_accessed=int(bytes_accessed))

    kernel = functools.partial(encoder_layer_kernel, num_heads=num_heads, eps=eps)
    return pl.pallas_call(
        kernel,
        out_shape=jax.ShapeDtypeStruct((B, S, D), x.dtype),
        grid=grid,
        in_specs=[
            pl.BlockSpec((block_b, S, D), lambda i: (i, 0, 0)),   # x
            pl.BlockSpec((block_b, 1, S), lambda i: (i, 0, 0)),   # mask
            const_spec((1, D)), const_spec((1, D)),               # LN1 gamma/beta
            const_spec((1, D)), const_spec((1, D)),               # LN2 gamma/beta
            const_spec((D, 3 * D)), const_spec((1, 3 * D)),       # Wqkv, bqkv
            const_spec((num_heads, dk, D)), const_spec((1, D)),   # Wo (per head), bo
            const_spec((D, d_ff)), const_spec((1, d_ff)),         # W1, b1
            const_spec((d_ff, D)), const_spec((1, D)),            # W2, b2
        ],
        out_specs=pl.BlockSpec((block_b, S, D), lambda i: (i, 0, 0)),
        compiler_params=pltpu.CompilerParams(
            dimension_semantics=("parallel",)),   # batch blocks independent
        cost_estimate=cost,
    )(x, mask,
      params["a1"], params["b1"], params["a2"], params["b2"],
      wqkv, bqkv, wo_h, params["bo"],
      w1, params["bf1"], w2, params["bf2"])


def reference(x, mask, params, *, num_heads=4, eps=1e-6):
    """Pure-JAX (f32) mirror of the PyTorch EncoderLayer forward (eval mode)."""
    def ln(t, g, b):
        m = t.mean(-1, keepdims=True)
        std = jnp.sqrt(((t - m) ** 2).sum(-1, keepdims=True) / (t.shape[-1] - 1))
        return g * (t - m) / (std + eps) + b

    B, S, D = x.shape
    dk = D // num_heads
    h = ln(x, params["a1"], params["b1"])
    q = h @ params["wq"] + params["bq"]
    k = h @ params["wk"] + params["bk"]
    v = h @ params["wv"] + params["bv"]
    mask_b = mask.reshape(B, 1, S)
    outs = []
    for hd in range(num_heads):
        sl = slice(hd * dk, (hd + 1) * dk)
        sc = jnp.einsum("bqd,bkd->bqk", q[..., sl], k[..., sl]) / jnp.sqrt(float(dk))
        sc = jnp.where(mask_b == 0, -1e9, sc)
        p = jax.nn.softmax(sc, axis=-1)
        outs.append(jnp.einsum("bqk,bkd->bqd", p, v[..., sl]))
    attn = jnp.concatenate(outs, axis=-1) @ params["wo"] + params["bo"]
    x1 = x + attn
    h2 = ln(x1, params["a2"], params["b2"])
    ff = jnp.maximum(h2 @ params["w1"] + params["bf1"], 0.0) @ params["w2"] + params["bf2"]
    return x1 + ff


if __name__ == "__main__":
    B, S, D, H, DFF = 2, 8, 32, 4, 64
    key = jax.random.PRNGKey(0)
    ks = jax.random.split(key, 14)

    def init(k, shape, scale=0.1):
        return (scale * jax.random.normal(k, shape)).astype(jnp.float32)

    params = {
        # LayerNorm params: torch inits ones / zeros
        "a1": jnp.ones((1, D), jnp.float32), "b1": jnp.zeros((1, D), jnp.float32),
        "a2": jnp.ones((1, D), jnp.float32), "b2": jnp.zeros((1, D), jnp.float32),
        # Multi-head self-attention projections (stored [in, out])
        "wq": init(ks[0], (D, D)), "bq": init(ks[1], (1, D)),
        "wk": init(ks[2], (D, D)), "bk": init(ks[3], (1, D)),
        "wv": init(ks[4], (D, D)), "bv": init(ks[5], (1, D)),
        "wo": init(ks[6], (D, D)), "bo": init(ks[7], (1, D)),
        # Position-wise feed-forward
        "w1": init(ks[8], (D, DFF)), "bf1": init(ks[9], (1, DFF)),
        "w2": init(ks[10], (DFF, D)), "bf2": init(ks[11], (1, D)),
    }

    x = jax.random.normal(ks[12], (B, S, D), dtype=jnp.float32)
    # mask out the last two key positions of each sequence
    mask = jnp.concatenate(
        [jnp.ones((B, 1, S - 2), jnp.float32), jnp.zeros((B, 1, 2), jnp.float32)],
        axis=-1)

    out = encoder_layer(x, mask, params, num_heads=H)
    out = jax.block_until_ready(out)

    ref = reference(x, mask, params, num_heads=H)
    assert out.shape == (B, S, D)
    # Kernel uses bf16 MXU operands (f32 accumulation) + approx reciprocal, so
    # compare against the f32 reference with a bf16-appropriate tolerance.
    assert jnp.allclose(out, ref, atol=5e-2, rtol=5e-2), "mismatch vs pure-JAX reference"
    print("KERNEL_OK")
</pallas_src>

<mosaic_0001>
module attributes {stable_mosaic.version = 11 : i64} {
  func.func @encoder_layer_kernel(%arg0: i32, %arg1: memref<2x8x32xf32, #tpu.memory_space<vmem>>, %arg2: memref<2x1x8xf32, #tpu.memory_space<vmem>>, %arg3: memref<1x32xf32, #tpu.memory_space<vmem>>, %arg4: memref<1x32xf32, #tpu.memory_space<vmem>>, %arg5: memref<1x32xf32, #tpu.memory_space<vmem>>, %arg6: memref<1x32xf32, #tpu.memory_space<vmem>>, %arg7: memref<32x96xbf16, #tpu.memory_space<vmem>>, %arg8: memref<1x96xf32, #tpu.memory_space<vmem>>, %arg9: memref<4x8x32xbf16, #tpu.memory_space<vmem>>, %arg10: memref<1x32xf32, #tpu.memory_space<vmem>>, %arg11: memref<32x64xbf16, #tpu.memory_space<vmem>>, %arg12: memref<1x64xf32, #tpu.memory_space<vmem>>, %arg13: memref<64x32xbf16, #tpu.memory_space<vmem>>, %arg14: memref<1x32xf32, #tpu.memory_space<vmem>>, %arg15: memref<2x8x32xf32, #tpu.memory_space<vmem>>) attributes {dimension_semantics = [#tpu.dimension_semantics<parallel>], iteration_bounds = array<i64: 1>, scalar_prefetch = 0 : i64, scratch_operands = 0 : i64, tpu.core_type = #tpu.core_type<tc>, window_params = [{transform_indices = @transform_0, window_bounds = array<i64: 2, 8, 32>}, {transform_indices = @transform_1, window_bounds = array<i64: 2, 1, 8>}, {pipeline_mode = #tpu.pipeline_mode<synchronous>, transform_indices = @transform_2, window_bounds = array<i64: 1, 32>}, {pipeline_mode = #tpu.pipeline_mode<synchronous>, transform_indices = @transform_3, window_bounds = array<i64: 1, 32>}, {pipeline_mode = #tpu.pipeline_mode<synchronous>, transform_indices = @transform_4, window_bounds = array<i64: 1, 32>}, {pipeline_mode = #tpu.pipeline_mode<synchronous>, transform_indices = @transform_5, window_bounds = array<i64: 1, 32>}, {pipeline_mode = #tpu.pipeline_mode<synchronous>, transform_indices = @transform_6, window_bounds = array<i64: 32, 96>}, {pipeline_mode = #tpu.pipeline_mode<synchronous>, transform_indices = @transform_7, window_bounds = array<i64: 1, 96>}, {pipeline_mode = #tpu.pipeline_mode<synchronous>, transform_indices = @transform_8, window_bounds = array<i64: 4, 8, 32>}, {pipeline_mode = #tpu.pipeline_mode<synchronous>, transform_indices = @transform_9, window_bounds = array<i64: 1, 32>}, {pipeline_mode = #tpu.pipeline_mode<synchronous>, transform_indices = @transform_10, window_bounds = array<i64: 32, 64>}, {pipeline_mode = #tpu.pipeline_mode<synchronous>, transform_indices = @transform_11, window_bounds = array<i64: 1, 64>}, {pipeline_mode = #tpu.pipeline_mode<synchronous>, transform_indices = @transform_12, window_bounds = array<i64: 64, 32>}, {pipeline_mode = #tpu.pipeline_mode<synchronous>, transform_indices = @transform_13, window_bounds = array<i64: 1, 32>}, {transform_indices = @transform_14, window_bounds = array<i64: 2, 8, 32>}]} {
    %c0 = arith.constant 0 : index
    %c0_0 = arith.constant 0 : index
    %c0_1 = arith.constant 0 : index
    %0 = vector.load %arg1[%c0, %c0_0, %c0_1] : memref<2x8x32xf32, #tpu.memory_space<vmem>>, vector<2x8x32xf32>
    %1 = vector.shape_cast %0 : vector<2x8x32xf32> to vector<16x32xf32>
    %c0_2 = arith.constant 0 : index
    %c0_3 = arith.constant 0 : index
    %2 = vector.load %arg3[%c0_2, %c0_3] : memref<1x32xf32, #tpu.memory_space<vmem>>, vector<1x32xf32>
    %3 = vector.shape_cast %2 : vector<1x32xf32> to vector<32xf32>
    %c0_4 = arith.constant 0 : index
    %c0_5 = arith.constant 0 : index
    %4 = vector.load %arg4[%c0_4, %c0_5] : memref<1x32xf32, #tpu.memory_space<vmem>>, vector<1x32xf32>
    %5 = vector.shape_cast %4 : vector<1x32xf32> to vector<32xf32>
    %cst = arith.constant dense<0.000000e+00> : vector<16xf32>
    %6 = vector.multi_reduction <add>, %1, %cst [1] : vector<16x32xf32> to vector<16xf32>
    %7 = vector.shape_cast %6 : vector<16xf32> to vector<16x1xf32>
    %cst_6 = arith.constant 3.200000e+01 : f32
    %8 = vector.broadcast %cst_6 : f32 to vector<16x1xf32>
    %9 = arith.divf %7, %8 : vector<16x1xf32>
    %10 = vector.broadcast %9 : vector<16x1xf32> to vector<16x32xf32>
    %11 = arith.subf %1, %10 : vector<16x32xf32>
    %12 = arith.mulf %11, %11 : vector<16x32xf32>
    %cst_7 = arith.constant dense<0.000000e+00> : vector<16xf32>
    %13 = vector.multi_reduction <add>, %12, %cst_7 [1] : vector<16x32xf32> to vector<16xf32>
    %14 = vector.shape_cast %13 : vector<16xf32> to vector<16x1xf32>
    %cst_8 = arith.constant 3.100000e+01 : f32
    %15 = vector.broadcast %cst_8 : f32 to vector<16x1xf32>
    %16 = arith.divf %14, %15 : vector<16x1xf32>
    %17 = math.sqrt %16 : vector<16x1xf32>
    %18 = vector.broadcast %9 : vector<16x1xf32> to vector<16x32xf32>
    %19 = arith.subf %1, %18 : vector<16x32xf32>
    %20 = vector.shape_cast %3 : vector<32xf32> to vector<1x32xf32>
    %21 = vector.broadcast %20 : vector<1x32xf32> to vector<16x32xf32>
    %22 = arith.mulf %21, %19 : vector<16x32xf32>
    %cst_9 = arith.constant 9.99999997E-7 : f32
    %23 = vector.broadcast %cst_9 : f32 to vector<16x1xf32>
    %24 = arith.addf %17, %23 : vector<16x1xf32>
    %25 = vector.broadcast %24 : vector<16x1xf32> to vector<16x32xf32>
    %26 = arith.divf %22, %25 : vector<16x32xf32>
    %27 = vector.shape_cast %5 : vector<32xf32> to vector<1x32xf32>
    %28 = vector.broadcast %27 : vector<1x32xf32> to vector<16x32xf32>
    %29 = arith.addf %26, %28 : vector<16x32xf32>
    %30 = arith.truncf %29 : vector<16x32xf32> to vector<16x32xbf16>
    %c0_10 = arith.constant 0 : index
    %c0_11 = arith.constant 0 : index
    %31 = vector.load %arg7[%c0_10, %c0_11] : memref<32x96xbf16, #tpu.memory_space<vmem>>, vector<32x96xbf16>
    %cst_12 = arith.constant dense<0.000000e+00> : vector<16x96xf32>
    %32 = tpu.matmul %30, %31, %cst_12 {dimension_numbers = #tpu.dot_dimension_numbers<[1], [0], [0], [1], [0, 0, 1, 1], [], []>} : vector<16x32xbf16>, vector<32x96xbf16>, vector<16x96xf32> -> vector<16x96xf32>
    %c0_13 = arith.constant 0 : index
    %c0_14 = arith.constant 0 : index
    %33 = vector.load %arg8[%c0_13, %c0_14] : memref<1x96xf32, #tpu.memory_space<vmem>>, vector<1x96xf32>
    %34 = vector.shape_cast %33 : vector<1x96xf32> to vector<96xf32>
    %35 = vector.shape_cast %34 : vector<96xf32> to vector<1x96xf32>
    %36 = vector.broadcast %35 : vector<1x96xf32> to vector<16x96xf32>
    %37 = arith.addf %32, %36 : vector<16x96xf32>
    %38 = vector.extract_strided_slice %37 {offsets = [0, 0], sizes = [16, 32], strides = [1, 1]} : vector<16x96xf32> to vector<16x32xf32>
    %cst_15 = arith.constant 0.353553385 : f32
    %39 = vector.broadcast %cst_15 : f32 to vector<16x32xf32>
    %40 = arith.mulf %38, %39 : vector<16x32xf32>
    %41 = arith.truncf %40 : vector<16x32xf32> to vector<16x32xbf16>
    %42 = vector.extract_strided_slice %37 {offsets = [0, 32], sizes = [16, 32], strides = [1, 1]} : vector<16x96xf32> to vector<16x32xf32>
    %43 = arith.truncf %42 : vector<16x32xf32> to vector<16x32xbf16>
    %44 = vector.extract_strided_slice %37 {offsets = [0, 64], sizes = [16, 32], strides = [1, 1]} : vector<16x96xf32> to vector<16x32xf32>
    %45 = arith.truncf %44 : vector<16x32xf32> to vector<16x32xbf16>
    %46 = vector.shape_cast %41 : vector<16x32xbf16> to vector<2x8x4x8xbf16>
    %47 = vector.shape_cast %43 : vector<16x32xbf16> to vector<2x8x4x8xbf16>
    %48 = vector.shape_cast %45 : vector<16x32xbf16> to vector<2x8x4x8xbf16>
    %c0_16 = arith.constant 0 : index
    %c0_17 = arith.constant 0 : index
    %c0_18 = arith.constant 0 : index
    %49 = vector.load %arg2[%c0_16, %c0_17, %c0_18] : memref<2x1x8xf32, #tpu.memory_space<vmem>>, vector<2x1x8xf32>
    %cst_19 = arith.constant 0.000000e+00 : f32
    %50 = vector.broadcast %cst_19 : f32 to vector<2x1x8xf32>
    %51 = arith.cmpf oeq, %49, %50 : vector<2x1x8xf32>
    %cst_20 = arith.constant -1.000000e+09 : f32
    %cst_21 = arith.constant 0.000000e+00 : f32
    %52 = vector.broadcast %cst_20 : f32 to vector<2x1x8xf32>
    %53 = vector.broadcast %cst_21 : f32 to vector<2x1x8xf32>
    %54 = arith.select %51, %52, %53 : vector<2x1x8xi1>, vector<2x1x8xf32>
    %c0_22 = arith.constant 0 : index
    %c0_23 = arith.constant 0 : index
    %c0_24 = arith.constant 0 : index
    %55 = vector.load %arg9[%c0_22, %c0_23, %c0_24] : memref<4x8x32xbf16, #tpu.memory_space<vmem>>, vector<4x8x32xbf16>
    %56 = vector.extract_strided_slice %46 {offsets = [0, 0, 0, 0], sizes = [1, 8, 4, 8], strides = [1, 1, 1, 1]} : vector<2x8x4x8xbf16> to vector<1x8x4x8xbf16>
    %57 = vector.shape_cast %56 : vector<1x8x4x8xbf16> to vector<8x4x8xbf16>
    %58 = vector.extract_strided_slice %47 {offsets = [0, 0, 0, 0], sizes = [1, 8, 4, 8], strides = [1, 1, 1, 1]} : vector<2x8x4x8xbf16> to vector<1x8x4x8xbf16>
    %59 = vector.shape_cast %58 : vector<1x8x4x8xbf16> to vector<8x4x8xbf16>
    "tpu.trace_start"() <{level = 10 : i32, message = "qhd,khd->hqk"}> : () -> ()
    %cst_25 = arith.constant dense<0.000000e+00> : vector<4x8x8xf32>
    %60 = tpu.matmul %57, %59, %cst_25 {dimension_numbers = #tpu.dot_dimension_numbers<[2], [2], [0], [0], [0, 1, 0, 0, 1, 0], [1], [1]>} : vector<8x4x8xbf16>, vector<8x4x8xbf16>, vector<4x8x8xf32> -> vector<4x8x8xf32>
    "tpu.trace_stop"() : () -> ()
    %61 = vector.extract_strided_slice %54 {offsets = [0, 0, 0], sizes = [1, 1, 8], strides = [1, 1, 1]} : vector<2x1x8xf32> to vector<1x1x8xf32>
    %62 = vector.shape_cast %61 : vector<1x1x8xf32> to vector<1x8xf32>
    %63 = vector.shape_cast %62 : vector<1x8xf32> to vector<1x1x8xf32>
    %64 = vector.broadcast %63 : vector<1x1x8xf32> to vector<4x8x8xf32>
    %65 = arith.addf %60, %64 : vector<4x8x8xf32>
    %cst_26 = arith.constant dense<0xFF800000> : vector<4x8xf32>
    %66 = vector.multi_reduction <maximumf>, %65, %cst_26 [2] : vector<4x8x8xf32> to vector<4x8xf32>
    %67 = vector.shape_cast %66 : vector<4x8xf32> to vector<4x8x1xf32>
    %68 = vector.broadcast %67 : vector<4x8x1xf32> to vector<4x8x8xf32>
    %69 = arith.subf %65, %68 : vector<4x8x8xf32>
    %70 = math.exp %69 : vector<4x8x8xf32>
    %cst_27 = arith.constant dense<0.000000e+00> : vector<4x8xf32>
    %71 = vector.multi_reduction <add>, %70, %cst_27 [2] : vector<4x8x8xf32> to vector<4x8xf32>
    %72 = vector.shape_cast %71 : vector<4x8xf32> to vector<4x8x1xf32>
    %73 = arith.truncf %70 : vector<4x8x8xf32> to vector<4x8x8xbf16>
    %74 = vector.extract_strided_slice %48 {offsets = [0, 0, 0, 0], sizes = [1, 8, 4, 8], strides = [1, 1, 1, 1]} : vector<2x8x4x8xbf16> to vector<1x8x4x8xbf16>
    %75 = vector.shape_cast %74 : vector<1x8x4x8xbf16> to vector<8x4x8xbf16>
    "tpu.trace_start"() <{level = 10 : i32, message = "hqk,khd->hqd"}> : () -> ()
    %cst_28 = arith.constant dense<0.000000e+00> : vector<4x8x8xf32>
    %76 = tpu.matmul %73, %75, %cst_28 {dimension_numbers = #tpu.dot_dimension_numbers<[2], [0], [1], [2], [0, 0, 0, 1, 1, 2], [0], [1]>} : vector<4x8x8xbf16>, vector<8x4x8xbf16>, vector<4x8x8xf32> -> vector<4x8x8xf32>
    "tpu.trace_stop"() : () -> ()
    %77 = tpu.reciprocal %72 {approx = true} : vector<4x8x1xf32> -> vector<4x8x1xf32>
    %78 = vector.broadcast %77 : vector<4x8x1xf32> to vector<4x8x8xf32>
    %79 = arith.mulf %76, %78 : vector<4x8x8xf32>
    %80 = arith.truncf %79 : vector<4x8x8xf32> to vector<4x8x8xbf16>
    "tpu.trace_start"() <{level = 10 : i32, message = "hqd,hde->hqe"}> : () -> ()
    %cst_29 = arith.constant dense<0.000000e+00> : vector<4x8x32xf32>
    %81 = tpu.matmul %80, %55, %cst_29 {dimension_numbers = #tpu.dot_dimension_numbers<[2], [1], [1], [2], [0, 0, 0, 1, 1, 2], [0], [0]>} : vector<4x8x8xbf16>, vector<4x8x32xbf16>, vector<4x8x32xf32> -> vector<4x8x32xf32>
    "tpu.trace_stop"() : () -> ()
    %cst_30 = arith.constant dense<0.000000e+00> : vector<8x32xf32>
    %82 = vector.multi_reduction <add>, %81, %cst_30 [0] : vector<4x8x32xf32> to vector<8x32xf32>
    %83 = vector.extract_strided_slice %46 {offsets = [1, 0, 0, 0], sizes = [1, 8, 4, 8], strides = [1, 1, 1, 1]} : vector<2x8x4x8xbf16> to vector<1x8x4x8xbf16>
    %84 = vector.shape_cast %83 : vector<1x8x4x8xbf16> to vector<8x4x8xbf16>
    %85 = vector.extract_strided_slice %47 {offsets = [1, 0, 0, 0], sizes = [1, 8, 4, 8], strides = [1, 1, 1, 1]} : vector<2x8x4x8xbf16> to vector<1x8x4x8xbf16>
    %86 = vector.shape_cast %85 : vector<1x8x4x8xbf16> to vector<8x4x8xbf16>
    "tpu.trace_start"() <{level = 10 : i32, message = "qhd,khd->hqk"}> : () -> ()
    %cst_31 = arith.constant dense<0.000000e+00> : vector<4x8x8xf32>
    %87 = tpu.matmul %84, %86, %cst_31 {dimension_numbers = #tpu.dot_dimension_numbers<[2], [2], [0], [0], [0, 1, 0, 0, 1, 0], [1], [1]>} : vector<8x4x8xbf16>, vector<8x4x8xbf16>, vector<4x8x8xf32> -> vector<4x8x8xf32>
    "tpu.trace_stop"() : () -> ()
    %88 = vector.extract_strided_slice %54 {offsets = [1, 0, 0], sizes = [1, 1, 8], strides = [1, 1, 1]} : vector<2x1x8xf32> to vector<1x1x8xf32>
    %89 = vector.shape_cast %88 : vector<1x1x8xf32> to vector<1x8xf32>
    %90 = vector.shape_cast %89 : vector<1x8xf32> to vector<1x1x8xf32>
    %91 = vector.broadcast %90 : vector<1x1x8xf32> to vector<4x8x8xf32>
    %92 = arith.addf %87, %91 : vector<4x8x8xf32>
    %cst_32 = arith.constant dense<0xFF800000> : vector<4x8xf32>
    %93 = vector.multi_reduction <maximumf>, %92, %cst_32 [2] : vector<4x8x8xf32> to vector<4x8xf32>
    %94 = vector.shape_cast %93 : vector<4x8xf32> to vector<4x8x1xf32>
    %95 = vector.broadcast %94 : vector<4x8x1xf32> to vector<4x8x8xf32>
    %96 = arith.subf %92, %95 : vector<4x8x8xf32>
    %97 = math.exp %96 : vector<4x8x8xf32>
    %cst_33 = arith.constant dense<0.000000e+00> : vector<4x8xf32>
    %98 = vector.multi_reduction <add>, %97, %cst_33 [2] : vector<4x8x8xf32> to vector<4x8xf32>
    %99 = vector.shape_cast %98 : vector<4x8xf32> to vector<4x8x1xf32>
    %100 = arith.truncf %97 : vector<4x8x8xf32> to vector<4x8x8xbf16>
    %101 = vector.extract_strided_slice %48 {offsets = [1, 0, 0, 0], sizes = [1, 8, 4, 8], strides = [1, 1, 1, 1]} : vector<2x8x4x8xbf16> to vector<1x8x4x8xbf16>
    %102 = vector.shape_cast %101 : vector<1x8x4x8xbf16> to vector<8x4x8xbf16>
    "tpu.trace_start"() <{level = 10 : i32, message = "hqk,khd->hqd"}> : () -> ()
    %cst_34 = arith.constant dense<0.000000e+00> : vector<4x8x8xf32>
    %103 = tpu.matmul %100, %102, %cst_34 {dimension_numbers = #tpu.dot_dimension_numbers<[2], [0], [1], [2], [0, 0, 0, 1, 1, 2], [0], [1]>} : vector<4x8x8xbf16>, vector<8x4x8xbf16>, vector<4x8x8xf32> -> vector<4x8x8xf32>
    "tpu.trace_stop"() : () -> ()
    %104 = tpu.reciprocal %99 {approx = true} : vector<4x8x1xf32> -> vector<4x8x1xf32>
    %105 = vector.broadcast %104 : vector<4x8x1xf32> to vector<4x8x8xf32>
    %106 = arith.mulf %103, %105 : vector<4x8x8xf32>
    %107 = arith.truncf %106 : vector<4x8x8xf32> to vector<4x8x8xbf16>
    "tpu.trace_start"() <{level = 10 : i32, message = "hqd,hde->hqe"}> : () -> ()
    %cst_35 = arith.constant dense<0.000000e+00> : vector<4x8x32xf32>
    %108 = tpu.matmul %107, %55, %cst_35 {dimension_numbers = #tpu.dot_dimension_numbers<[2], [1], [1], [2], [0, 0, 0, 1, 1, 2], [0], [0]>} : vector<4x8x8xbf16>, vector<4x8x32xbf16>, vector<4x8x32xf32> -> vector<4x8x32xf32>
    "tpu.trace_stop"() : () -> ()
    %cst_36 = arith.constant dense<0.000000e+00> : vector<8x32xf32>
    %109 = vector.multi_reduction <add>, %108, %cst_36 [0] : vector<4x8x32xf32> to vector<8x32xf32>
    %110 = tpu.concatenate %82, %109 in 0 : vector<8x32xf32>, vector<8x32xf32> -> vector<16x32xf32>
    %c0_37 = arith.constant 0 : index
    %c0_38 = arith.constant 0 : index
    %111 = vector.load %arg10[%c0_37, %c0_38] : memref<1x32xf32, #tpu.memory_space<vmem>>, vector<1x32xf32>
    %112 = vector.shape_cast %111 : vector<1x32xf32> to vector<32xf32>
    %113 = vector.shape_cast %112 : vector<32xf32> to vector<1x32xf32>
    %114 = vector.broadcast %113 : vector<1x32xf32> to vector<16x32xf32>
    %115 = arith.addf %110, %114 : vector<16x32xf32>
    %116 = arith.addf %1, %115 : vector<16x32xf32>
    %c0_39 = arith.constant 0 : index
    %c0_40 = arith.constant 0 : index
    %117 = vector.load %arg5[%c0_39, %c0_40] : memref<1x32xf32, #tpu.memory_space<vmem>>, vector<1x32xf32>
    %118 = vector.shape_cast %117 : vector<1x32xf32> to vector<32xf32>
    %c0_41 = arith.constant 0 : index
    %c0_42 = arith.constant 0 : index
    %119 = vector.load %arg6[%c0_41, %c0_42] : memref<1x32xf32, #tpu.memory_space<vmem>>, vector<1x32xf32>
    %120 = vector.shape_cast %119 : vector<1x32xf32> to vector<32xf32>
    %cst_43 = arith.constant dense<0.000000e+00> : vector<16xf32>
    %121 = vector.multi_reduction <add>, %116, %cst_43 [1] : vector<16x32xf32> to vector<16xf32>
    %122 = vector.shape_cast %121 : vector<16xf32> to vector<16x1xf32>
    %cst_44 = arith.constant 3.200000e+01 : f32
    %123 = vector.broadcast %cst_44 : f32 to vector<16x1xf32>
    %124 = arith.divf %122, %123 : vector<16x1xf32>
    %125 = vector.broadcast %124 : vector<16x1xf32> to vector<16x32xf32>
    %126 = arith.subf %116, %125 : vector<16x32xf32>
    %127 = arith.mulf %126, %126 : vector<16x32xf32>
    %cst_45 = arith.constant dense<0.000000e+00> : vector<16xf32>
    %128 = vector.multi_reduction <add>, %127, %cst_45 [1] : vector<16x32xf32> to vector<16xf32>
    %129 = vector.shape_cast %128 : vector<16xf32> to vector<16x1xf32>
    %cst_46 = arith.constant 3.100000e+01 : f32
    %130 = vector.broadcast %cst_46 : f32 to vector<16x1xf32>
    %131 = arith.divf %129, %130 : vector<16x1xf32>
    %132 = math.sqrt %131 : vector<16x1xf32>
    %133 = vector.broadcast %124 : vector<16x1xf32> to vector<16x32xf32>
    %134 = arith.subf %116, %133 : vector<16x32xf32>
    %135 = vector.shape_cast %118 : vector<32xf32> to vector<1x32xf32>
    %136 = vector.broadcast %135 : vector<1x32xf32> to vector<16x32xf32>
    %137 = arith.mulf %136, %134 : vector<16x32xf32>
    %cst_47 = arith.constant 9.99999997E-7 : f32
    %138 = vector.broadcast %cst_47 : f32 to vector<16x1xf32>
    %139 = arith.addf %132, %138 : vector<16x1xf32>
    %140 = vector.broadcast %139 : vector<16x1xf32> to vector<16x32xf32>
    %141 = arith.divf %137, %140 : vector<16x32xf32>
    %142 = vector.shape_cast %120 : vector<32xf32> to vector<1x32xf32>
    %143 = vector.broadcast %142 : vector<1x32xf32> to vector<16x32xf32>
    %144 = arith.addf %141, %143 : vector<16x32xf32>
    %145 = arith.truncf %144 : vector<16x32xf32> to vector<16x32xbf16>
    %c0_48 = arith.constant 0 : index
    %c0_49 = arith.constant 0 : index
    %146 = vector.load %arg11[%c0_48, %c0_49] : memref<32x64xbf16, #tpu.memory_space<vmem>>, vector<32x64xbf16>
    %cst_50 = arith.constant dense<0.000000e+00> : vector<16x64xf32>
    %147 = tpu.matmul %145, %146, %cst_50 {dimension_numbers = #tpu.dot_dimension_numbers<[1], [0], [0], [1], [0, 0, 1, 1], [], []>} : vector<16x32xbf16>, vector<32x64xbf16>, vector<16x64xf32> -> vector<16x64xf32>
    %c0_51 = arith.constant 0 : index
    %c0_52 = arith.constant 0 : index
    %148 = vector.load %arg12[%c0_51, %c0_52] : memref<1x64xf32, #tpu.memory_space<vmem>>, vector<1x64xf32>
    %149 = vector.shape_cast %148 : vector<1x64xf32> to vector<64xf32>
    %150 = vector.shape_cast %149 : vector<64xf32> to vector<1x64xf32>
    %151 = vector.broadcast %150 : vector<1x64xf32> to vector<16x64xf32>
    %152 = arith.addf %147, %151 : vector<16x64xf32>
    %cst_53 = arith.constant 0.000000e+00 : f32
    %153 = vector.broadcast %cst_53 : f32 to vector<16x64xf32>
    %154 = arith.maximumf %152, %153 : vector<16x64xf32>
    %155 = arith.truncf %154 : vector<16x64xf32> to vector<16x64xbf16>
    %c0_54 = arith.constant 0 : index
    %c0_55 = arith.constant 0 : index
    %156 = vector.load %arg13[%c0_54, %c0_55] : memref<64x32xbf16, #tpu.memory_space<vmem>>, vector<64x32xbf16>
    %cst_56 = arith.constant dense<0.000000e+00> : vector<16x32xf32>
    %157 = tpu.matmul %155, %156, %cst_56 {dimension_numbers = #tpu.dot_dimension_numbers<[1], [0], [0], [1], [0, 0, 1, 1], [], []>} : vector<16x64xbf16>, vector<64x32xbf16>, vector<16x32xf32> -> vector<16x32xf32>
    %c0_57 = arith.constant 0 : index
    %c0_58 = arith.constant 0 : index
    %158 = vector.load %arg14[%c0_57, %c0_58] : memref<1x32xf32, #tpu.memory_space<vmem>>, vector<1x32xf32>
    %159 = vector.shape_cast %158 : vector<1x32xf32> to vector<32xf32>
    %160 = vector.shape_cast %159 : vector<32xf32> to vector<1x32xf32>
    %161 = vector.broadcast %160 : vector<1x32xf32> to vector<16x32xf32>
    %162 = arith.addf %157, %161 : vector<16x32xf32>
    %163 = arith.addf %116, %162 : vector<16x32xf32>
    %164 = vector.shape_cast %163 : vector<16x32xf32> to vector<2x8x32xf32>
    %c0_59 = arith.constant 0 : index
    %c0_60 = arith.constant 0 : index
    %c0_61 = arith.constant 0 : index
    %165 = vector.load %arg15[%c0_59, %c0_60, %c0_61] : memref<2x8x32xf32, #tpu.memory_space<vmem>>, vector<2x8x32xf32>
    tpu.vector_store %arg15[%c0_59, %c0_60, %c0_61], %164 {strides = array<i32>} : memref<2x8x32xf32, #tpu.memory_space<vmem>>, vector<2x8x32xf32>,
    return
  }
  func.func @transform_0(%arg0: i32) -> (i32, i32, i32) {
    %c0_i32 = arith.constant 0 : i32
    %c0_i32_0 = arith.constant 0 : i32
    %c0_i32_1 = arith.constant 0 : i32
    return %arg0, %c0_i32, %c0_i32_0 : i32, i32, i32
  }
  func.func @transform_1(%arg0: i32) -> (i32, i32, i32) {
    %c0_i32 = arith.constant 0 : i32
    %c0_i32_0 = arith.constant 0 : i32
    %c0_i32_1 = arith.constant 0 : i32
    return %arg0, %c0_i32, %c0_i32_0 : i32, i32, i32
  }
  func.func @transform_2(%arg0: i32) -> (i32, i32) {
    %c0_i32 = arith.constant 0 : i32
    %c0_i32_0 = arith.constant 0 : i32
    %c0_i32_1 = arith.constant 0 : i32
    return %c0_i32, %c0_i32_0 : i32, i32
  }
  func.func @transform_3(%arg0: i32) -> (i32, i32) {
    %c0_i32 = arith.constant 0 : i32
    %c0_i32_0 = arith.constant 0 : i32
    %c0_i32_1 = arith.constant 0 : i32
    return %c0_i32, %c0_i32_0 : i32, i32
  }
  func.func @transform_4(%arg0: i32) -> (i32, i32) {
    %c0_i32 = arith.constant 0 : i32
    %c0_i32_0 = arith.constant 0 : i32
    %c0_i32_1 = arith.constant 0 : i32
    return %c0_i32, %c0_i32_0 : i32, i32
  }
  func.func @transform_5(%arg0: i32) -> (i32, i32) {
    %c0_i32 = arith.constant 0 : i32
    %c0_i32_0 = arith.constant 0 : i32
    %c0_i32_1 = arith.constant 0 : i32
    return %c0_i32, %c0_i32_0 : i32, i32
  }
  func.func @transform_6(%arg0: i32) -> (i32, i32) {
    %c0_i32 = arith.constant 0 : i32
    %c0_i32_0 = arith.constant 0 : i32
    %c0_i32_1 = arith.constant 0 : i32
    return %c0_i32, %c0_i32_0 : i32, i32
  }
  func.func @transform_7(%arg0: i32) -> (i32, i32) {
    %c0_i32 = arith.constant 0 : i32
    %c0_i32_0 = arith.constant 0 : i32
    %c0_i32_1 = arith.constant 0 : i32
    return %c0_i32, %c0_i32_0 : i32, i32
  }
  func.func @transform_8(%arg0: i32) -> (i32, i32, i32) {
    %c0_i32 = arith.constant 0 : i32
    %c0_i32_0 = arith.constant 0 : i32
    %c0_i32_1 = arith.constant 0 : i32
    %c0_i32_2 = arith.constant 0 : i32
    return %c0_i32, %c0_i32_0, %c0_i32_1 : i32, i32, i32
  }
  func.func @transform_9(%arg0: i32) -> (i32, i32) {
    %c0_i32 = arith.constant 0 : i32
    %c0_i32_0 = arith.constant 0 : i32
    %c0_i32_1 = arith.constant 0 : i32
    return %c0_i32, %c0_i32_0 : i32, i32
  }
  func.func @transform_10(%arg0: i32) -> (i32, i32) {
    %c0_i32 = arith.constant 0 : i32
    %c0_i32_0 = arith.constant 0 : i32
    %c0_i32_1 = arith.constant 0 : i32
    return %c0_i32, %c0_i32_0 : i32, i32
  }
  func.func @transform_11(%arg0: i32) -> (i32, i32) {
    %c0_i32 = arith.constant 0 : i32
    %c0_i32_0 = arith.constant 0 : i32
    %c0_i32_1 = arith.constant 0 : i32
    return %c0_i32, %c0_i32_0 : i32, i32
  }
  func.func @transform_12(%arg0: i32) -> (i32, i32) {
    %c0_i32 = arith.constant 0 : i32
    %c0_i32_0 = arith.constant 0 : i32
    %c0_i32_1 = arith.constant 0 : i32
    return %c0_i32, %c0_i32_0 : i32, i32
  }
  func.func @transform_13(%arg0: i32) -> (i32, i32) {
    %c0_i32 = arith.constant 0 : i32
    %c0_i32_0 = arith.constant 0 : i32
    %c0_i32_1 = arith.constant 0 : i32
    return %c0_i32, %c0_i32_0 : i32, i32
  }
  func.func @transform_14(%arg0: i32) -> (i32, i32, i32) {
    %c0_i32 = arith.constant 0 : i32
    %c0_i32_0 = arith.constant 0 : i32
    %c0_i32_1 = arith.constant 0 : i32
    return %arg0, %c0_i32, %c0_i32_0 : i32, i32, i32
  }
}

</mosaic_0001>

<bundles_post_ra>
// kernel: tpu_custom_call.1
= control target key start
LH: loop header
LB: loop body
LE: loop exit
PB: predicated region body
PF: predicated region fallthrough
CT: control target
= control target key end

     0   :  { %19 = vsyncpa [#allocation3], 0  ;;  %s4579_s0 = inlined_call_operand.vmem [shape: f32[2,8,32], index: 0, kind: input, shape index: {}]   ;;  %s4580_s1 = inlined_call_operand.vmem [shape: f32[2,1,8], index: 1, kind: input, shape index: {}]   ;;  %s4581_s2 = inlined_call_operand.hbm [shape: f32[1,32], index: 2, kind: input, shape index: {}]   ;;  %s4582_s3 = inlined_call_operand.hbm [shape: f32[1,32], index: 3, kind: input, shape index: {}]   ;;  %s4583_s4 = inlined_call_operand.hbm [shape: f32[1,32], index: 4, kind: input, shape index: {}]   ;;  %s4584_s5 = inlined_call_operand.hbm [shape: f32[1,32], index: 5, kind: input, shape index: {}]   ;;  %s4585_s6 = inlined_call_operand.vmem [shape: bf16[32,96], index: 6, kind: input, shape index: {}]   ;;  %s4586_s7 = inlined_call_operand.hbm [shape: f32[1,96], index: 7, kind: input, shape index: {}]   ;;  %s4587_s8 = inlined_call_operand.vmem [shape: bf16[4,8,32], index: 8, kind: input, shape index: {}]   ;;  %s4588_s9 = inlined_call_operand.hbm [shape: f32[1,32], index: 9, kind: input, shape index: {}]   ;;  %s4589_s10 = inlined_call_operand.vmem [shape: bf16[32,64], index: 10, kind: input, shape index: {}]   ;;  %s4590_s11 = inlined_call_operand.vmem [shape: f32[1,64], index: 11, kind: input, shape index: {}]   ;;  %s4591_s12 = inlined_call_operand.vmem [shape: bf16[64,32], index: 12, kind: input, shape index: {}]   ;;  %s4592_s13 = inlined_call_operand.vmem [shape: f32[1,32], index: 13, kind: input, shape index: {}]   ;;  %s4593_s14 = inlined_call_operand.hbm [shape: f32[2,8,32], index: 14, kind: output, shape index: {}]  }
   0x1   :  { %20 = vsyncpa [#allocation6], 0 }
   0x2   :  { %21 = vsyncpa [#allocation9], 0 }
   0x3   :  { %22 = vsyncpa [#allocation12], 0 }
   0x4   :  { %23 = vsyncpa [#allocation4], 0  ;;  %s3823_s29 = smov [#allocation5]   ;;  %s3824_s15 = smov [#allocation8]  }
   0x5   :  { %s44_s30 = sshll.u32 %s3823_s29, 4  ;;  %s64_s16 = sshll.u32 %s3824_s15, 4  ;;  %s45_s30 = int_to_ptr.vmem [resolvable:$true] %s44_s30  ;;  %s65_s16 = int_to_ptr.vmem [resolvable:$true] %s64_s16 }
   0x6   :  { %s3659_s19 = scalar_lea.hbm %s4582_s3, 16 }
   0x7   :  { %p3660_p0 = scmp.ne.s32.totalorder %s4582_s3, %s3659_s19  ;;  %p3663_p1 = scmp.lt.u32.totalorder %s3659_s19, %s4582_s3 }
   0x9   :  { %p3665_p2 = pnand %p3663_p1, %p3660_p0 }
   0xb   :  { %3668 = shalt.err (!%p3665_p2)
}
   0xc   :  { %s3669_s24 = scalar_lea.vmem %s45_s30, 16  ;;  %s3673_s25 = scalar_lea.vmem %s45_s30, 32 }
   0xd   :  { %p3670_p3 = scmp.ne.s32.totalorder %s45_s30, %s3669_s24  ;;  %p3674_p4 = scmp.lt.s32.totalorder %s45_s30, %s45_s30 }
   0xe   :  { %p3675_p5 = scmp.lt.s32.totalorder %s3673_s25, %s3669_s24 }
  0x10   :  { %p3676_p6 = por %p3675_p5, %p3674_p4 }
  0x12   :  { %p3677_p7 = pnand %p3676_p6, %p3670_p3 }
  0x14   :  { %3680 = shalt.err (!%p3677_p7)
}
  0x15   :  { %47 = dma.hbm_to_vmem [thread:$0]  %s4582_s3, 16, %s45_s30, [#allocation6]  }
  0x16   :  { %s3681_s15 = scalar_lea.hbm %s4584_s5, 16 }
  0x17   :  { %p3682_p8 = scmp.ne.s32.totalorder %s4584_s5, %s3681_s15  ;;  %p3685_p9 = scmp.lt.u32.totalorder %s3681_s15, %s4584_s5 }
  0x19   :  { %p3687_p10 = pnand %p3685_p9, %p3682_p8 }
  0x1b   :  { %3690 = shalt.err (!%p3687_p10)
}
  0x1c   :  { %s3691_s21 = scalar_lea.vmem %s65_s16, 16  ;;  %s3695_s22 = scalar_lea.vmem %s65_s16, 32 }
  0x1d   :  { %p3692_p11 = scmp.ne.s32.totalorder %s65_s16, %s3691_s21  ;;  %p3696_p12 = scmp.lt.s32.totalorder %s65_s16, %s65_s16 }
  0x1e   :  { %p3697_p13 = scmp.lt.s32.totalorder %s3695_s22, %s3691_s21 }
  0x20   :  { %p3698_p0 = por %p3697_p13, %p3696_p12 }
  0x22   :  { %p3699_p1 = pnand %p3698_p0, %p3692_p11 }
  0x24   :  { %3702 = shalt.err (!%p3699_p1)
}
  0x25   :  { %67 = dma.hbm_to_vmem [thread:$0]  %s4584_s5, 16, %s65_s16, [#allocation9]  }
  0x26   :  { %s3825_s23 = smov [#allocation2]   ;;  %s3826_s25 = smov [#allocation7]  }
  0x27   :  { %s34_s24 = sshll.u32 %s3825_s23, 4  ;;  %s54_s26 = sshll.u32 %s3826_s25, 4  ;;  %s35_s24 = int_to_ptr.vmem [resolvable:$true] %s34_s24  ;;  %s55_s26 = int_to_ptr.vmem [resolvable:$true] %s54_s26 }
  0x28   :  { %s3703_s29 = scalar_lea.hbm %s4581_s2, 16 }
  0x29   :  { %p3704_p2 = scmp.ne.s32.totalorder %s4581_s2, %s3703_s29  ;;  %p3707_p3 = scmp.lt.u32.totalorder %s3703_s29, %s4581_s2 }
  0x2b   :  { %p3709_p4 = pnand %p3707_p3, %p3704_p2 }
  0x2d   :  { %3712 = shalt.err (!%p3709_p4)
}
  0x2e   :  { %s3713_s5 = scalar_lea.vmem %s35_s24, 16  ;;  %s3717_s16 = scalar_lea.vmem %s35_s24, 32 }
  0x2f   :  { %p3714_p5 = scmp.ne.s32.totalorder %s35_s24, %s3713_s5  ;;  %p3718_p6 = scmp.lt.s32.totalorder %s35_s24, %s35_s24 }
  0x30   :  { %p3719_p7 = scmp.lt.s32.totalorder %s3717_s16, %s3713_s5 }
  0x32   :  { %p3720_p8 = por %p3719_p7, %p3718_p6 }
  0x34   :  { %p3721_p9 = pnand %p3720_p8, %p3714_p5 }
  0x36   :  { %3724 = shalt.err (!%p3721_p9)
}
  0x37   :  { %37 = dma.hbm_to_vmem [thread:$0]  %s4581_s2, 16, %s35_s24, [#allocation3]  }
  0x38   :  { %s3725_s30 = scalar_lea.hbm %s4583_s4, 16 }
  0x39   :  { %p3726_p10 = scmp.ne.s32.totalorder %s4583_s4, %s3725_s30  ;;  %p3729_p11 = scmp.lt.u32.totalorder %s3725_s30, %s4583_s4 }
  0x3b   :  { %p3731_p12 = pnand %p3729_p11, %p3726_p10 }
  0x3d   :  { %3734 = shalt.err (!%p3731_p12)
}
  0x3e   :  { %s3735_s29 = scalar_lea.vmem %s55_s26, 16  ;;  %s3739_s15 = scalar_lea.vmem %s55_s26, 32 }
  0x3f   :  { %p3736_p13 = scmp.ne.s32.totalorder %s55_s26, %s3735_s29  ;;  %p3740_p0 = scmp.lt.s32.totalorder %s55_s26, %s55_s26 }
  0x40   :  { %p3741_p1 = scmp.lt.s32.totalorder %s3739_s15, %s3735_s29 }
  0x42   :  { %p3742_p2 = por %p3741_p1, %p3740_p0 }
  0x44   :  { %p3743_p3 = pnand %p3742_p2, %p3736_p13 }
  0x46   :  { %3746 = shalt.err (!%p3743_p3)
}
  0x47   :  { %57 = dma.hbm_to_vmem [thread:$0]  %s4583_s4, 16, %s55_s26, [#allocation6]  }
  0x48   :  { %s3827_s17 = smov [#allocation10]   ;;  %s3828_s19 = smov [#allocation11]  }
  0x49   :  { %s76_s18 = sshll.u32 %s3827_s17, 4  ;;  %s88_s5 = sshll.u32 %s3828_s19, 4  ;;  %s77_s18 = int_to_ptr.vmem [resolvable:$true] %s76_s18  ;;  %s89_s5 = int_to_ptr.vmem [resolvable:$true] %s88_s5 }
  0x4a   :  { %s3747_s21 = scalar_lea.hbm %s4586_s7, 16 }
  0x4b   :  { %p3748_p4 = scmp.ne.s32.totalorder %s4586_s7, %s3747_s21  ;;  %p3751_p5 = scmp.lt.u32.totalorder %s3747_s21, %s4586_s7 }
  0x4d   :  { %p3753_p6 = pnand %p3751_p5, %p3748_p4 }
  0x4f   :  { %3756 = shalt.err (!%p3753_p6)
}
  0x50   :  { %s3757_s4 = scalar_lea.vmem %s77_s18, 16  ;;  %s3761_s26 = scalar_lea.vmem %s77_s18, 32 }
  0x51   :  { %p3758_p7 = scmp.ne.s32.totalorder %s77_s18, %s3757_s4  ;;  %p3762_p8 = scmp.lt.s32.totalorder %s77_s18, %s77_s18 }
  0x52   :  { %p3763_p9 = scmp.lt.s32.totalorder %s3761_s26, %s3757_s4 }
  0x54   :  { %p3764_p10 = por %p3763_p9, %p3762_p8 }
  0x56   :  { %p3765_p11 = pnand %p3764_p10, %p3758_p7 }
  0x58   :  { %3768 = shalt.err (!%p3765_p11)
}
  0x59   :  { %79 = dma.hbm_to_vmem [thread:$0]  %s4586_s7, 16, %s77_s18, [#allocation9]  }
  0x5a   :  { %s3769_s15 = scalar_lea.hbm %s4588_s9, 16 }
  0x5b   :  { %p3770_p12 = scmp.ne.s32.totalorder %s4588_s9, %s3769_s15  ;;  %p3773_p13 = scmp.lt.u32.totalorder %s3769_s15, %s4588_s9 }
  0x5d   :  { %p3775_p0 = pnand %p3773_p13, %p3770_p12 }
  0x5f   :  { %3778 = shalt.err (!%p3775_p0)
}
  0x60   :  { %s3779_s16 = scalar_lea.vmem %s89_s5, 16  ;;  %s3783_s20 = scalar_lea.vmem %s89_s5, 32 }
  0x61   :  { %p3780_p1 = scmp.ne.s32.totalorder %s89_s5, %s3779_s16  ;;  %p3784_p2 = scmp.lt.s32.totalorder %s89_s5, %s89_s5 }
  0x62   :  { %p3785_p3 = scmp.lt.s32.totalorder %s3783_s20, %s3779_s16 }
  0x64   :  { %p3786_p4 = por %p3785_p3, %p3784_p2 }
  0x66   :  { %p3787_p5 = pnand %p3786_p4, %p3780_p1 }
  0x68   :  { %3790 = shalt.err (!%p3787_p5)
}
  0x69   :  { %91 = dma.hbm_to_vmem [thread:$0]  %s4588_s9, 16, %s89_s5, [#allocation12]  }
  0x6a   :  { %3813 = dma.done.wait [#allocation3], 16  }
  0x6b   :  { %3814 = vsyncadd [#allocation3], 4294967280 }
  0x6c   :  { %3815 = dma.done.wait [#allocation6], 32  }
  0x6d   :  { %3816 = vsyncadd [#allocation6], 4294967264 }
  0x6e   :  { %3817 = dma.done.wait [#allocation9], 32  }
  0x6f   :  { %3818 = vsyncadd [#allocation9], 4294967264 }
  0x70   :  { %3819 = dma.done.wait [#allocation12], 16  }
  0x71   :  { %3820 = vsyncadd [#allocation12], 4294967280  ;;  %vm123_vm0 = vcmask 261120   ;;  %v119_v0 = vld [vmem:[%s4579_s0] sm:$0xff]  ;;  %v120_v1 = vld [vmem:[%s4579_s0 + $0x8] sm:$0xff]  ;;  %v3829_v15 = vmov 0.0   ;;  %v287_v60 = vlaneseq }
  0x72   :  { %v124_v2 = vsel %vm123_vm0, %v119_v0, 0.0  ;;  %v127_v3 = vsel %vm123_vm0, %v120_v1, 0.0  ;;  %v3601_v14 = vld [vmem:[%s4585_s6] sm:$0xff]   ;;  %3410 = vmatprep.subr.bf16.mxu0 %v3829_v15  ;;  %vm3830_vm1 = vmmov 0   ;;  %v3602_v16 = vld [vmem:[%s4585_s6 + $0x8] sm:$0xff]   ;;  %3424 = vmatprep.subr.bf16.mxu1 %v3829_v15  ;;  %s3831_s6 = smov 112  }
  0x73   :  { %125 = vadd.xlane.f32.xlu0 %v124_v2  ;;  %3414 = vmatprep.mubr.msk.bf16.mxu0 %vm3830_vm1, %v3829_v15  ;;  %v3300_v33 = vld [vmem:[#allocation2] ss:$0 sm:$0xff]  ;;  %v3301_v39 = vld [vmem:[#allocation5] ss:$0 sm:$0xff]  ;;  %v3302_v44 = vld [vmem:[#allocation10] ss:$0 sm:$0xff] }
  0x74   :  { %3411 = vmatpush3.bf16.msra.mxu0 %v3601_v14  ;;  %3426 = vmatprep.mubr.msk.bf16.mxu1 %vm3830_vm1, %v3829_v15  ;;  %s3832_s26 = smov 120   ;;  %s3833_s25 = smov 104   ;;  %v3835_v58 = vmov 1983009808   ;;  %v3836_v62 = vmov 1934713408  }
  0x75   :  { %3412 = vmatprep.subr.bf16.mxu0 %v3829_v15  ;;  %s3834_s27 = smov 96   ;;  %v285_v59 = vunpack.c.l.s4 %v3835_v58  ;;  %v316_v63 = vunpack.c.l.s4 %v3836_v62  ;;  %s3838_s28 = smov 64   ;;  %vm1234_vm6 = vcmask 1043456   ;;  %vm1230_vm7 = vcmask 64512  }
  0x76   :  { %vm3231_vm14 = vcmask 523264  }
  0x77   :  { %128 = vadd.xlane.f32.xlu0 %v127_v3 }
  0x78   :  { %3413 = vmatpush3.bf16.msra.mxu0 %v3602_v16 }
  0x79   :  { %3418 = vmatprep.subr.bf16.mxu0 %v3829_v15 }
 0x100   :  { %v126_v4 = vpop.xlane.xlu0 %125 }
 0x101   :  { %v131_v5 = vmul.f32 0.03125, %v126_v4 }
 0x103   :  { %v133_v6 = vsub.f32 %v119_v0, %v131_v5  ;;  %v286_v0 = vunpack.c.0.s8 %v285_v59 }
 0x104   :  { %v129_v7 = vpop.xlane.xlu0 %128 }
 0x105   :  { %v132_v8 = vmul.f32 0.03125, %v129_v7  ;;  %v135_v9 = vmul.f32 %v133_v6, %v133_v6  ;;  %v166_v35 = vmul.f32 %v3300_v33, %v133_v6  ;;  %v3837_v6 = vmov 0  }
 0x106   :  { %v4040_v7 = vpack.i.b16 %v3837_v6, %v3837_v6 }
 0x107   :  { %v134_v10 = vsub.f32 %v120_v1, %v132_v8  ;;  %v137_v11 = vsel %vm123_vm0, %v135_v9, 0.0  ;;  %v4036_v1 = vshrl.u32 %v287_v60, 7  ;;  %v317_v9 = vunpack.c.0.s8 %v316_v63 }
 0x108   :  { %138 = vadd.xlane.f32.xlu1 %v137_v11 }
 0x109   :  { %v136_v12 = vmul.f32 %v134_v10, %v134_v10  ;;  %v167_v36 = vmul.f32 %v3300_v33, %v134_v10  ;;  %v4043_v10 = vsub.s32 %v286_v0, %v4036_v1 }
 0x10b   :  { %v140_v13 = vsel %vm123_vm0, %v136_v12, 0.0 }
 0x10c   :  { %141 = vadd.xlane.f32.xlu1 %v140_v13 }
 0x195   :  { %v139_v17 = vpop.xlane.xlu1 %138 }
 0x196   :  { %v144_v18 = vmul.f32 0.032258064, %v139_v17 }
 0x198   :  { %3609 = vrsqrt.f32 %v144_v18  ;;  %vm148_vm2 = vcmp.eq.f32.partialorder %v144_v18, inf  ;;  %v151_v23 = vand.u32 2147483648, %v144_v18  ;;  %vm150_vm3 = vcmp.eq.f32.partialorder %v144_v18, 0.0 }
 0x199   :  { %v142_v19 = vpop.xlane.xlu1 %141 }
 0x19a   :  { %v145_v20 = vmul.f32 0.032258064, %v142_v19  ;;  %v4048_v19 = vsub.s32 %v317_v9, %v4036_v1 }
 0x19c   :  { %3611 = vrsqrt.f32 %v145_v20  ;;  %vm155_vm4 = vcmp.eq.f32.partialorder %v145_v20, inf  ;;  %v158_v29 = vand.u32 2147483648, %v145_v20  ;;  %vm157_vm5 = vcmp.eq.f32.partialorder %v145_v20, 0.0 }
 0x1a2   :  { %v3610_v21 = vpop.eup %3609 }
 0x1a3   :  { %v147_v22 = vmul.f32 %v3610_v21, %v144_v18 }
 0x1a5   :  { %v149_v24 = vsel %vm148_vm2, %v144_v18, %v147_v22 }
 0x1a6   :  { %v3612_v25 = vpop.eup %3611  ;;  %v152_v26 = vsel %vm150_vm3, %v151_v23, %v149_v24 }
 0x1a7   :  { %v168_v27 = vadd.f32 1e-06, %v152_v26  ;;  %v154_v28 = vmul.f32 %v3612_v25, %v145_v20 }
 0x1a9   :  { %3613 = vrcp.f32 %v168_v27  ;;  %v156_v30 = vsel %vm155_vm4, %v145_v20, %v154_v28 }
 0x1aa   :  { %v159_v31 = vsel %vm157_vm5, %v158_v29, %v156_v30 }
 0x1ab   :  { %v169_v32 = vadd.f32 1e-06, %v159_v31 }
 0x1ad   :  { %3615 = vrcp.f32 %v169_v32 }
 0x1b3   :  { %v3614_v34 = vpop.eup %3613 }
 0x1b4   :  { %v171_v37 = vmul.f32 %v3614_v34, %v166_v35 }
 0x1b6   :  { %v180_v41 = vadd.f32 %v3301_v39, %v171_v37 }
 0x1b7   :  { %v3616_v38 = vpop.eup %3615 }
 0x1b8   :  { %v173_v40 = vmul.f32 %v3616_v38, %v167_v36 }
 0x1ba   :  { %v181_v42 = vadd.f32 %v3301_v39, %v173_v40 }
 0x1bc   :  { %v182_v43 = vpack.c.bf16 %v181_v42, %v180_v41 }
 0x1be   :  { %3415 = vmatmul.mubr.msk.bf16.vlgmr.msra.gmra.mrb[0].mxu0 %vm123_vm0, %v182_v43 }
 0x1bf   :  { %3420 = vmatprep.mubr.msk.bf16.mxu0 %vm3830_vm1, %v3829_v15 }
 0x291   :  { %v243_v45 = vpop.f32.mrb[0].mxu0 }
 0x292   :  { %v244_v46 = vadd.f32 %v3302_v44, %v243_v45  ;;  %v3416_v47 = vpop.f32.mrb[1].mxu0 }
 0x293   :  { %v246_v48 = vpop.f32.mrb[2].mxu0 }
 0x294   :  { %v247_v49 = vadd.f32 %v3302_v44, %v246_v48  ;;  %v3417_v50 = vpop.f32.mrb[3].mxu0  ;;  %v250_v51 = vmul.f32 0.35355338, %v244_v46 }
 0x296   :  { %v251_v52 = vmul.f32 0.35355338, %v247_v49  ;;  %v4016_v53 = vpack.c.bf16 %v247_v49, %v244_v46 }
 0x298   :  { %v4018_v54 = vpack.c.bf16 %v251_v52, %v250_v51  ;;  %418 = vrot.lane.b32.xlu1 %v4016_v53, %s3831_s6  ;;  %416 = vrot.lane.b32.xlu0 %v4016_v53, %s3832_s26 }
 0x29c   :  { %420 = vrot.lane.b32.xlu1 %v4016_v53, %s3833_s25 }
 0x2a0   :  { %422 = vrot.lane.b32.xlu1 %v4016_v53, %s3834_s27 }
 0x30a   :  { %v4027_v55 = vpop.permute.xlu1 %418  ;;  %v4029_v56 = vpop.permute.xlu0 %416 }
 0x30b   :  { %426 = vrot.lane.b32.xlu1 %v4027_v55, %s3834_s27  ;;  %424 = vrot.lane.b32.xlu0 %v4029_v56, %s3834_s27 }
 0x30e   :  { %v4033_v57 = vpop.permute.xlu1 %420 }
 0x30f   :  { %428 = vrot.lane.b32.xlu0 %v4033_v57, %s3834_s27 }
 0x312   :  { %v423_v61 = vpop.permute.xlu1 %422 }
 0x313   :  { %v434_v3 = vshrl.u32 %v423_v61, 16 }
 0x37d   :  { %v425_v2 = vpop.permute.xlu0 %424  ;;  %v427_v5 = vpop.permute.xlu1 %426 }
 0x37e   :  { %v435_v4 = vshrl.u32 %v425_v2, 16  ;;  %v432_v8 = vpack.i.b16 %v425_v2, %v423_v61  ;;  %v442_v13 = vshrl.u32 %v427_v5, 16 }
 0x380   :  { %v436_v11 = vpack.i.b16 %v435_v4, %v434_v3  ;;  %v446_v17 = vcombine.high %v432_v8, %v4040_v7  ;;  %v453_v20 = vrot.slane %v432_v8, %v4043_v10 }
 0x381   :  { %v429_v12 = vpop.permute.xlu0 %428 }
 0x382   :  { %v440_v14 = vpack.i.b16 %v429_v12, %v427_v5  ;;  %v443_v16 = vshrl.u32 %v429_v12, 16  ;;  %v512_v18 = vcombine.high %v436_v11, %v4040_v7  ;;  %v519_v24 = vrot.slane %v436_v11, %v4043_v10 }
 0x383   :  { %v4060_v29 = vrot.slane %v446_v17, %v4043_v10 }
 0x384   :  { %v444_v21 = vpack.i.b16 %v443_v16, %v442_v13  ;;  %v461_v22 = vcombine.high %v440_v14, %v4040_v7  ;;  %v468_v23 = vrot.slane %v440_v14, %v4043_v10  ;;  %v4063_v30 = vrot.slane %v512_v18, %v4043_v10 }
 0x386   :  { %v4055_v25 = vrot.slane %v461_v22, %v4043_v10  ;;  %v527_v26 = vcombine.high %v444_v21, %v4040_v7  ;;  %v476_v27 = vcombine.low %v453_v20, %v468_v23  ;;  %v534_v28 = vrot.slane %v444_v21, %v4043_v10 }
 0x387   :  { %v477_v34 = vcombine.high %v453_v20, %v468_v23 }
 0x388   :  { %v4066_v31 = vrot.slane %v527_v26, %v4043_v10  ;;  %v484_v32 = vrot.slane %v476_v27, %v4048_v19  ;;  %v542_v33 = vcombine.low %v519_v24, %v534_v28  ;;  %v492_v35 = vcombine.low %v4060_v29, %v4055_v25 }
 0x389   :  { %v493_v36 = vcombine.high %v4060_v29, %v4055_v25  ;;  %v491_v40 = vrot.slane %v477_v34, %v4048_v19  ;;  %v543_v42 = vcombine.high %v519_v24, %v534_v28 }
 0x38a   :  { %812 = vxpose.xlu1.c.b16.start.end [1/1] (short) (narrow) %v484_v32, 16  ;;  %v550_v37 = vrot.slane %v542_v33, %v4048_v19  ;;  %v558_v38 = vcombine.low %v4063_v30, %v4066_v31  ;;  %v559_v39 = vcombine.high %v4063_v30, %v4066_v31  ;;  %v508_v41 = vcombine.high %v484_v32, %v3837_v6 }
 0x38b   :  { %v509_v43 = vcombine.high %v491_v40, %v3837_v6  ;;  %v557_v44 = vrot.slane %v543_v42, %v4048_v19 }
 0x38c   :  { %828 = vxpose.xlu0.c.b16.start.end [1/1] (short) (narrow) %v550_v37, 16  ;;  %v574_v45 = vcombine.high %v550_v37, %v3837_v6 }
 0x38d   :  { %v575_v46 = vcombine.high %v557_v44, %v3837_v6 }
 0x38e   :  { %876 = vxpose.xlu1.c.b16.start.end [1/1] (short) (narrow) %v491_v40, 16 }
 0x390   :  { %844 = vxpose.xlu0.c.b16.start.end [1/1] (short) (narrow) %v508_v41, 16 }
 0x392   :  { %908 = vxpose.xlu1.c.b16.start.end [1/1] (short) (narrow) %v509_v43, 16 }
 0x394   :  { %892 = vxpose.xlu0.c.b16.start.end [1/1] (short) (narrow) %v557_v44, 16 }
 0x396   :  { %255 = vrot.lane.b32.xlu1 %v4018_v54, %s3832_s26 }
 0x398   :  { %860 = vxpose.xlu0.c.b16.start.end [1/1] (short) (narrow) %v574_v45, 16 }
 0x39a   :  { %259 = vrot.lane.b32.xlu1 %v4018_v54, %s3833_s25 }
 0x39c   :  { %924 = vxpose.xlu0.c.b16.start.end [1/1] (short) (narrow) %v575_v46, 16  ;;  %v265_v46 = vshrl.u32 %v4018_v54, 16 }
 0x3a5   :  { %257 = vrot.lane.b32.xlu0 %v4018_v54, %s3831_s6 }
 0x3f0   :  { %v820_v47 = vpop.trf.xlu1 }
 0x3f2   :  { %v836_v48 = vpop.trf.xlu0 }
 0x3f4   :  { %v884_v49 = vpop.trf.xlu1 }
 0x3f5   :  { %v940_v58 = vcombine.low %v820_v47, %v884_v49 }
 0x3f6   :  { %v852_v50 = vpop.trf.xlu0 }
 0x3f7   :  { %v947_v61 = vrot.slane %v940_v58, %v4043_v10 }
 0x3f8   :  { %v916_v51 = vpop.trf.xlu1 }
 0x3f9   :  { %v948_v59 = vcombine.low %v852_v50, %v916_v51 }
 0x3fa   :  { %v900_v52 = vpop.trf.xlu0 }
 0x3fb   :  { %v955_v62 = vrot.slane %v948_v59, %v4043_v10  ;;  %v974_v63 = vcombine.low %v836_v48, %v900_v52 }
 0x3fd   :  { %v956_v3 = vcombine.low %v947_v61, %v955_v62  ;;  %v957_v4 = vcombine.high %v947_v61, %v955_v62  ;;  %v981_v5 = vrot.slane %v974_v63, %v4043_v10 }
 0x3fe   :  { %v868_v60 = vpop.trf.xlu0 }
 0x3ff   :  { %v964_v12 = vrot.slane %v956_v3, %v4048_v19  ;;  %v971_v13 = vrot.slane %v957_v4, %v4048_v19 }
 0x401   :  { %v1012_v23 = vshrl.u32 %v964_v12, 16  ;;  %v1028_v24 = vshrl.u32 %v971_v13, 16  ;;  %v972_v26 = vcombine.high %v964_v12, %v3837_v6  ;;  %v973_v40 = vcombine.high %v971_v13, %v3837_v6 }
 0x402   :  { %v932_v0 = vpop.trf.xlu0 }
 0x403   :  { %v982_v2 = vcombine.low %v868_v60, %v932_v0  ;;  %v1020_v37 = vshrl.u32 %v972_v26, 16  ;;  %v1036_v48 = vshrl.u32 %v973_v40, 16 }
 0x405   :  { %v989_v8 = vrot.slane %v982_v2, %v4043_v10 }
 0x407   :  { %v990_v9 = vcombine.low %v981_v5, %v989_v8  ;;  %v991_v11 = vcombine.high %v981_v5, %v989_v8 }
 0x408   :  { %v256_v27 = vpop.permute.xlu1 %255 }
 0x409   :  { %v998_v14 = vrot.slane %v990_v9, %v4048_v19  ;;  %v1005_v16 = vrot.slane %v991_v11, %v4048_v19  ;;  %v4103_v41 = vpack.i.b16 %v256_v27, %v4018_v54  ;;  %v266_v42 = vshrl.u32 %v256_v27, 16 }
 0x40b   :  { %v1026_v17 = vpack.i.b16 %v1005_v16, %v971_v13  ;;  %v1010_v18 = vpack.i.b16 %v998_v14, %v964_v12  ;;  %v1013_v20 = vshrl.u32 %v998_v14, 16  ;;  %v1029_v21 = vshrl.u32 %v1005_v16, 16 }
 0x40c   :  { %v1006_v22 = vcombine.high %v998_v14, %v3837_v6  ;;  %v1007_v34 = vcombine.high %v1005_v16, %v3837_v6  ;;  %v260_v47 = vpop.permute.xlu1 %259  ;;  %v267_v49 = vpack.i.b16 %v266_v42, %v265_v46  ;;  %v283_v50 = vcombine.high %v4103_v41, %v4040_v7 }
 0x40d   :  { %1104 = vxpose.xlu0.c.b16.start.end [1/1] (short) (narrow) %v1026_v17, 16  ;;  %1040 = vxpose.xlu1.c.b16.start.end [1/1] (short) (narrow) %v1010_v18, 16  ;;  %v1014_v28 = vpack.i.b16 %v1013_v20, %v1012_v23  ;;  %v1030_v32 = vpack.i.b16 %v1029_v21, %v1028_v24  ;;  %v274_v58 = vshrl.u32 %v260_v47, 16 }
 0x40e   :  { %v1021_v33 = vshrl.u32 %v1006_v22, 16  ;;  %v1018_v43 = vpack.i.b16 %v1006_v22, %v972_v26  ;;  %v1037_v45 = vshrl.u32 %v1007_v34, 16  ;;  %v1034_v52 = vpack.i.b16 %v1007_v34, %v973_v40 }
 0x40f   :  { %v349_v54 = vcombine.high %v267_v49, %v4040_v7  ;;  %v297_v0 = vrot.slane %v283_v50, %v4043_v10  ;;  %v356_v50 = vrot.slane %v267_v49, %v4043_v10 }
 0x410   :  { %v1022_v44 = vpack.i.b16 %v1021_v33, %v1020_v37  ;;  %v1038_v61 = vpack.i.b16 %v1037_v45, %v1036_v48 }
 0x411   :  { %1056 = vxpose.xlu0.c.b16.start.end [1/1] (short) (narrow) %v1014_v28, 16  ;;  %1120 = vxpose.xlu1.c.b16.start.end [1/1] (short) (narrow) %v1030_v32, 16  ;;  %v363_v8 = vrot.slane %v349_v54, %v4043_v10 }
 0x415   :  { %1072 = vxpose.xlu0.c.b16.start.end [1/1] (short) (narrow) %v1018_v43, 16  ;;  %1088 = vxpose.xlu1.c.b16.start.end [1/1] (short) (narrow) %v1022_v44, 16 }
 0x417   :  { %v258_v51 = vpop.permute.xlu0 %257 }
 0x418   :  { %v271_v59 = vpack.i.b16 %v260_v47, %v258_v51  ;;  %v273_v60 = vshrl.u32 %v258_v51, 16 }
 0x419   :  { %1136 = vxpose.xlu0.c.b16.start.end [1/1] (short) (narrow) %v1034_v52, 16  ;;  %1152 = vxpose.xlu1.c.b16.start.end [1/1] (short) (narrow) %v1038_v61, 16 }
 0x41a   :  { %v275_v62 = vpack.i.b16 %v274_v58, %v273_v60  ;;  %v298_v63 = vcombine.high %v271_v59, %v4040_v7  ;;  %v305_v51 = vrot.slane %v271_v59, %v4043_v10  ;;  %v290_v60 = vrot.slane %v4103_v41, %v4043_v10 }
 0x41c   :  { %v312_v2 = vrot.slane %v298_v63, %v4043_v10  ;;  %v364_v3 = vcombine.high %v275_v62, %v4040_v7  ;;  %v371_v48 = vrot.slane %v275_v62, %v4043_v10  ;;  %v313_v54 = vcombine.low %v290_v60, %v305_v51 }
 0x41d   :  { %580 = vrot.lane.b32.xlu1 %v4029_v56, %s3838_s28 }
 0x41e   :  { %v329_v4 = vcombine.low %v297_v0, %v312_v2  ;;  %v330_v5 = vcombine.high %v297_v0, %v312_v2  ;;  %v378_v9 = vrot.slane %v364_v3, %v4043_v10  ;;  %v379_v52 = vcombine.low %v356_v50, %v371_v48 }
 0x41f   :  { %v380_v58 = vcombine.high %v356_v50, %v371_v48  ;;  %v314_v0 = vcombine.high %v290_v60, %v305_v51  ;;  %v321_v62 = vrot.slane %v313_v54, %v4048_v19 }
 0x420   :  { %v337_v11 = vrot.slane %v329_v4, %v4048_v19  ;;  %v344_v12 = vrot.slane %v330_v5, %v4048_v19  ;;  %v395_v13 = vcombine.low %v363_v8, %v378_v9  ;;  %v396_v14 = vcombine.high %v363_v8, %v378_v9 }
 0x421   :  { %582 = vrot.lane.b32.xlu1 %v4027_v55, %s3838_s28  ;;  %v387_v2 = vrot.slane %v379_v52, %v4048_v19  ;;  %v394_v3 = vrot.slane %v380_v58, %v4048_v19  ;;  %v328_v49 = vrot.slane %v314_v0, %v4048_v19 }
 0x422   :  { %v1911_v16 = vcombine.low %v337_v11, %v344_v12  ;;  %v3322_v17 = vcombine.high %v337_v11, %v344_v12  ;;  %v403_v18 = vrot.slane %v395_v13, %v4048_v19  ;;  %v410_v20 = vrot.slane %v396_v14, %v4048_v19 }
 0x423   :  { %v775_v59 = vcombine.low %v387_v2, %v394_v3  ;;  %v3307_v8 = vcombine.high %v387_v2, %v394_v3  ;;  %v750_v12 = vcombine.low %v321_v62, %v328_v49  ;;  %v3306_v41 = vcombine.high %v321_v62, %v328_v49 }
 0x424   :  { %v1918_v56 = vrot.slane %v1911_v16, %v4043_v10  ;;  %v1926_v21 = vrot.slane %v3322_v17, %v4043_v10  ;;  %v1936_v22 = vcombine.low %v403_v18, %v410_v20  ;;  %v3323_v23 = vcombine.high %v403_v18, %v410_v20 }
 0x425   :  { %v782_v13 = vrot.slane %v775_v59, %v4043_v10  ;;  %v790_v14 = vrot.slane %v3307_v8, %v4043_v10 }
 0x426   :  { %v1927_v24 = vcombine.low %v1918_v56, %v1926_v21  ;;  %v1943_v26 = vrot.slane %v1936_v22, %v4043_v10  ;;  %v1951_v27 = vrot.slane %v3323_v23, %v4043_v10  ;;  %v757_v21 = vrot.slane %v750_v12, %v4043_v10 }
 0x427   :  { %v765_v22 = vrot.slane %v3306_v41, %v4043_v10 }
 0x428   :  { %v4128_v28 = vrot.slane %v1927_v24, %v4048_v19  ;;  %v1952_v32 = vcombine.low %v1943_v26, %v1951_v27  ;;  %v791_v24 = vcombine.low %v782_v13, %v790_v14 }
 0x42a   :  { %v4131_v55 = vrot.slane %v1952_v32, %v4048_v19  ;;  %v4135_v33 = vcombine.high %v4128_v28, %v3837_v6  ;;  %v1964_v34 = vshrl.u32 %v4128_v28, 16  ;;  %v798_v50 = vrot.slane %v791_v24, %v4048_v19 }
 0x42c   :  { %v1965_v37 = vshrl.u32 %v4131_v55, 16  ;;  %v1963_v40 = vpack.i.b16 %v4131_v55, %v4128_v28  ;;  %v4143_v42 = vcombine.high %v4131_v55, %v3837_v6  ;;  %v1970_v44 = vshrl.u32 %v4135_v33, 16 }
 0x42d   :  { %v804_v0 = vshrl.u32 %v798_v50, 16  ;;  %v799_v41 = vcombine.high %v798_v50, %v3837_v6 }
 0x42e   :  { %v4145_v43 = vpack.i.b16 %v1965_v37, %v1964_v34  ;;  %v1971_v45 = vshrl.u32 %v4143_v42, 16  ;;  %v1969_v46 = vpack.i.b16 %v4143_v42, %v4135_v33 }
 0x430   :  { %v4151_v47 = vpack.i.b16 %v1971_v45, %v1970_v44  ;;  %v766_v44 = vcombine.low %v757_v21, %v765_v22  ;;  %v747_v21 = vsub.s32 0, %v4036_v1 }
 0x432   :  { %v773_v60 = vrot.slane %v766_v44, %v4048_v19 }
 0x434   :  { %v802_v59 = vpack.i.b16 %v798_v50, %v773_v60  ;;  %v803_v8 = vshrl.u32 %v773_v60, 16  ;;  %v774_v14 = vcombine.high %v773_v60, %v3837_v6 }
 0x436   :  { %v805_v12 = vpack.i.b16 %v804_v0, %v803_v8  ;;  %v573_v8 = vrot.slane %v559_v39, %v4048_v19 }
 0x473   :  { %v1112_v61 = vpop.trf.xlu0  ;;  %v1048_v63 = vpop.trf.xlu1 }
 0x474   :  { %v1168_v16 = vcombine.low %v1048_v63, %v1112_v61 }
 0x476   :  { %v1175_v26 = vrot.slane %v1168_v16, %v4043_v10  ;;  %v810_v16 = vshrl.u32 %v799_v41, 16 }
 0x477   :  { %v1064_v4 = vpop.trf.xlu0  ;;  %v1128_v5 = vpop.trf.xlu1 }
 0x478   :  { %v1193_v17 = vcombine.low %v1064_v4, %v1128_v5 }
 0x47a   :  { %v1200_v32 = vrot.slane %v1193_v17, %v4043_v10  ;;  %v808_v17 = vpack.i.b16 %v799_v41, %v774_v14 }
 0x47b   :  { %v1080_v9 = vpop.trf.xlu0  ;;  %v1096_v11 = vpop.trf.xlu1 }
 0x47f   :  { %v1144_v18 = vpop.trf.xlu0  ;;  %v1160_v56 = vpop.trf.xlu1 }
 0x480   :  { %v1176_v20 = vcombine.low %v1080_v9, %v1144_v18  ;;  %v1201_v23 = vcombine.low %v1096_v11, %v1160_v56  ;;  %v809_v18 = vshrl.u32 %v774_v14, 16  ;;  %v734_v56 = vld [vmem:[%s4580_s1] sm:$0x1] }
 0x481   :  { %vm736_vm8 = vcmp.eq.f32.partialorder %v734_v56, 0.0 }
 0x482   :  { %v1183_v27 = vrot.slane %v1176_v20, %v4043_v10  ;;  %v1208_v34 = vrot.slane %v1201_v23, %v4043_v10  ;;  %v811_v20 = vpack.i.b16 %v810_v16, %v809_v18  ;;  %v738_v22 = vsel %vm736_vm8, -1e+09, %v3829_v15 }
 0x483   :  { %v748_v23 = vrot.slane %v738_v22, %v747_v21 }
 0x484   :  { %v1184_v37 = vcombine.low %v1175_v26, %v1183_v27  ;;  %v1209_v45 = vcombine.low %v1200_v32, %v1208_v34 }
 0x486   :  { %v1191_v48 = vrot.slane %v1184_v37, %v4048_v19  ;;  %v1216_v51 = vrot.slane %v1209_v45, %v4048_v19 }
 0x488   :  { %v1221_v52 = vshrl.u32 %v1191_v48, 16  ;;  %v1192_v58 = vcombine.high %v1191_v48, %v3837_v6  ;;  %v1220_v61 = vpack.i.b16 %v1216_v51, %v1191_v48  ;;  %v1222_v63 = vshrl.u32 %v1216_v51, 16 }
 0x489   :  { %v1217_v54 = vcombine.high %v1216_v51, %v3837_v6 }
 0x48a   :  { %v1227_v2 = vshrl.u32 %v1192_v58, 16  ;;  %v1236_v3 = vsel %vm1234_vm6, %v1220_v61, 0  ;;  %v1223_v4 = vpack.i.b16 %v1222_v63, %v1221_v52 }
 0x48b   :  { %v1226_v5 = vpack.i.b16 %v1217_v54, %v1192_v58  ;;  %v1228_v62 = vshrl.u32 %v1217_v54, 16  ;;  %3419 = vmatpush3.bf16.msra.mxu0 %v1236_v3 }
 0x48c   :  { %v1282_v49 = vsel %vm1234_vm6, %v1223_v4, 0  ;;  %3430 = vmatprep.subr.bf16.mxu0 %v3829_v15 }
 0x48d   :  { %v1229_v9 = vpack.i.b16 %v1228_v62, %v1227_v2  ;;  %3425 = vmatpush3.bf16.msra.mxu1 %v1282_v49  ;;  %v1328_v11 = vsel %vm1234_vm6, %v1226_v5, 0 }
 0x48e   :  { %3421 = vmatmul.mubr.msk.bf16.vlgmr.msra.gmra.mrb[4].mxu0 %vm1230_vm7, %v802_v59  ;;  %3436 = vmatprep.subr.bf16.mxu1 %v3829_v15 }
 0x48f   :  { %3431 = vmatpush3.bf16.msra.mxu0 %v1328_v11  ;;  %3432 = vmatprep.mubr.msk.bf16.mxu0 %vm3830_vm1, %v3829_v15  ;;  %v1374_v13 = vsel %vm1234_vm6, %v1229_v9, 0 }
 0x490   :  { %3427 = vmatmul.mubr.msk.bf16.vlgmr.msra.gmra.mrb[0].mxu1 %vm1230_vm7, %v805_v12  ;;  %3442 = vmatprep.subr.bf16.mxu0 %v3829_v15  ;;  %v581_v12 = vpop.permute.xlu1 %580 }
 0x491   :  { %3437 = vmatpush3.bf16.msra.mxu1 %v1374_v13  ;;  %3438 = vmatprep.mubr.msk.bf16.mxu1 %vm3830_vm1, %v3829_v15  ;;  %v591_v13 = vshrl.u32 %v581_v12, 16 }
 0x492   :  { %3448 = vmatprep.subr.bf16.mxu1 %v3829_v15 }
 0x494   :  { %v583_v41 = vpop.permute.xlu1 %582 }
 0x495   :  { %v598_v22 = vshrl.u32 %v583_v41, 16 }
 0x496   :  { %3433 = vmatmul.mubr.msk.bf16.vlgmr.msra.gmra.mrb[8].mxu0 %vm1230_vm7, %v808_v17 }
 0x497   :  { %3444 = vmatprep.mubr.msk.bf16.mxu0 %vm3830_vm1, %v3829_v15 }
 0x498   :  { %3439 = vmatmul.mubr.msk.bf16.vlgmr.msra.gmra.mrb[4].mxu1 %vm1230_vm7, %v811_v20 }
 0x499   :  { %3450 = vmatprep.mubr.msk.bf16.mxu1 %vm3830_vm1, %v3829_v15 }
 0x561   :  { %v1272_v24 = vpop.f32.mrb[4].mxu0 }
 0x562   :  { %v1273_v26 = vadd.f32 %v1272_v24, %v748_v23  ;;  %v3422_v27 = vpop.f32.mrb[5].mxu0 }
 0x563   :  { %v1275_v32 = vpop.f32.mrb[6].mxu0  ;;  %v1318_v34 = vpop.f32.mrb[0].mxu1 }
 0x564   :  { %v4205_v37 = vadd.f32 %v1318_v34, %v748_v23  ;;  %v3423_v44 = vpop.f32.mrb[7].mxu0  ;;  %v3428_v45 = vpop.f32.mrb[1].mxu1  ;;  %v1416_v48 = vsel %vm1230_vm7, %v1273_v26, -inf }
 0x565   :  { %v1321_v50 = vpop.f32.mrb[2].mxu1  ;;  %1417 = vmax.xlane.f32.xlu0 %v1416_v48 }
 0x566   :  { %v3429_v51 = vpop.f32.mrb[3].mxu1  ;;  %v1419_v52 = vsel %vm1230_vm7, %v4205_v37, -inf }
 0x567   :  { %1420 = vmax.xlane.f32.xlu1 %v1419_v52 }
 0x569   :  { %v1364_v58 = vpop.f32.mrb[8].mxu0 }
 0x56a   :  { %v3434_v60 = vpop.f32.mrb[9].mxu0  ;;  %v4214_v4 = vadd.f32 %v1364_v58, %v748_v23 }
 0x56b   :  { %v1367_v61 = vpop.f32.mrb[10].mxu0  ;;  %v1410_v63 = vpop.f32.mrb[4].mxu1 }
 0x56c   :  { %v3435_v54 = vpop.f32.mrb[11].mxu0  ;;  %v3440_v0 = vpop.f32.mrb[5].mxu1  ;;  %v4216_v5 = vadd.f32 %v1410_v63, %v748_v23  ;;  %v1422_v62 = vsel %vm1230_vm7, %v4214_v4, -inf }
 0x56d   :  { %v1413_v2 = vpop.f32.mrb[6].mxu1 }
 0x56e   :  { %v3441_v3 = vpop.f32.mrb[7].mxu1  ;;  %v1425_v49 = vsel %vm1230_vm7, %v4216_v5, -inf }
 0x578   :  { %584 = vrot.lane.b32.xlu1 %v4033_v57, %s3838_s28  ;;  %v500_v57 = vrot.slane %v492_v35, %v4048_v19  ;;  %v577_v35 = vcombine.high %v573_v8, %v3837_v6 }
 0x57a   :  { %v510_v59 = vcombine.high %v500_v57, %v3837_v6 }
 0x57b   :  { %578 = vrot.lane.b32.xlu0 %v4016_v53, %s3838_s28  ;;  %v566_v53 = vrot.slane %v558_v38, %v4048_v19  ;;  %v507_v38 = vrot.slane %v493_v36, %v4048_v19 }
 0x57d   :  { %v576_v9 = vcombine.high %v566_v53, %v3837_v6  ;;  %v511_v11 = vcombine.high %v507_v38, %v3837_v6 }
 0x59a   :  { %1423 = vmax.xlane.f32.xlu0 %v1422_v62 }
 0x59c   :  { %1426 = vmax.xlane.f32.xlu1 %v1425_v49 }
 0x5c7   :  { %1973 = vxpose.xlu0.c.b16.start.end [1/1] (short) (narrow) %v500_v57, 16 }
 0x5c9   :  { %1989 = vxpose.xlu1.c.b16.start.end [1/1] (short) (narrow) %v566_v53, 16 }
 0x5cb   :  { %2005 = vxpose.xlu0.c.b16.start.end [1/1] (short) (narrow) %v510_v59, 16 }
 0x5cd   :  { %2053 = vxpose.xlu1.c.b16.start.end [1/1] (short) (narrow) %v573_v8, 16 }
 0x5cf   :  { %2021 = vxpose.xlu0.c.b16.start.end [1/1] (short) (narrow) %v576_v9, 16 }
 0x5d1   :  { %2085 = vxpose.xlu1.c.b16.start.end [1/1] (short) (narrow) %v577_v35, 16 }
 0x5d3   :  { %2037 = vxpose.xlu0.c.b16.start.end [1/1] (short) (narrow) %v507_v38, 16 }
 0x5d7   :  { %2069 = vxpose.xlu0.c.b16.start.end [1/1] (short) (narrow) %v511_v11, 16 }
 0x5f2   :  { %v1418_v30 = vpop.xlane.xlu0 %1417 }
 0x5f3   :  { %v1428_v14 = vsub.f32 %v1273_v26, %v1418_v30 }
 0x5f4   :  { %v1421_v31 = vpop.xlane.xlu1 %1420 }
 0x5f5   :  { %v1432_v36 = vmul.f32 1.442695, %v1428_v14  ;;  %v1429_v23 = vsub.f32 %v4205_v37, %v1421_v31 }
 0x5f6   :  { %v579_v39 = vpop.permute.xlu0 %578 }
 0x5f7   :  { %v588_v16 = vpack.i.b16 %v581_v12, %v579_v39  ;;  %v590_v17 = vshrl.u32 %v579_v39, 16  ;;  %3617 = vpow2.f32 %v1432_v36  ;;  %v1434_v52 = vmul.f32 1.442695, %v1429_v23 }
 0x5f8   :  { %v585_v18 = vpop.permute.xlu1 %584 }
 0x5f9   :  { %v592_v20 = vpack.i.b16 %v591_v13, %v590_v17  ;;  %v602_v56 = vcombine.high %v588_v16, %v4040_v7  ;;  %v596_v25 = vpack.i.b16 %v585_v18, %v583_v41  ;;  %v599_v29 = vshrl.u32 %v585_v18, 16 }
 0x5fa   :  { %v609_v24 = vrot.slane %v588_v16, %v4043_v10  ;;  %3619 = vpow2.f32 %v1434_v52 }
 0x5fb   :  { %v600_v27 = vpack.i.b16 %v599_v29, %v598_v22  ;;  %v617_v32 = vcombine.high %v596_v25, %v4040_v7  ;;  %v624_v34 = vrot.slane %v596_v25, %v4043_v10  ;;  %v616_v26 = vrot.slane %v602_v56, %v4043_v10 }
 0x5fc   :  { %v668_v44 = vcombine.high %v592_v20, %v4040_v7  ;;  %v675_v37 = vrot.slane %v592_v20, %v4043_v10 }
 0x5fd   :  { %v631_v45 = vrot.slane %v617_v32, %v4043_v10  ;;  %v632_v48 = vcombine.low %v609_v24, %v624_v34  ;;  %v633_v50 = vcombine.high %v609_v24, %v624_v34  ;;  %v683_v51 = vcombine.high %v600_v27, %v4040_v7 }
 0x5fe   :  { %v690_v58 = vrot.slane %v600_v27, %v4043_v10  ;;  %v682_v0 = vrot.slane %v668_v44, %v4043_v10 }
 0x5ff   :  { %v640_v60 = vrot.slane %v632_v48, %v4048_v19  ;;  %v647_v61 = vrot.slane %v633_v50, %v4048_v19  ;;  %v648_v63 = vcombine.low %v616_v26, %v631_v45  ;;  %v649_v54 = vcombine.high %v616_v26, %v631_v45 }
 0x600   :  { %v697_v2 = vrot.slane %v683_v51, %v4043_v10  ;;  %v698_v3 = vcombine.low %v675_v37, %v690_v58  ;;  %v699_v62 = vcombine.high %v675_v37, %v690_v58 }
 0x601   :  { %v656_v7 = vrot.slane %v648_v63, %v4048_v19  ;;  %v663_v49 = vrot.slane %v649_v54, %v4048_v19  ;;  %v1456_v57 = vcombine.low %v640_v60, %v647_v61  ;;  %v3312_v53 = vcombine.high %v640_v60, %v647_v61  ;;  %v4270_v29 = vpop.eup %3617 }
 0x602   :  { %v706_v59 = vrot.slane %v698_v3, %v4048_v19  ;;  %v713_v8 = vrot.slane %v699_v62, %v4048_v19  ;;  %v714_v9 = vcombine.low %v682_v0, %v697_v2  ;;  %v715_v35 = vcombine.high %v682_v0, %v697_v2 }
 0x603   :  { %v1463_v38 = vrot.slane %v1456_v57, %v4043_v10  ;;  %v1471_v11 = vrot.slane %v3312_v53, %v4043_v10  ;;  %v2615_v12 = vcombine.low %v656_v7, %v663_v49  ;;  %v3328_v41 = vcombine.high %v656_v7, %v663_v49 }
 0x604   :  { %v722_v30 = vrot.slane %v714_v9, %v4048_v19  ;;  %v729_v31 = vrot.slane %v715_v35, %v4048_v19  ;;  %v1481_v39 = vcombine.low %v706_v59, %v713_v8  ;;  %v3313_v13 = vcombine.high %v706_v59, %v713_v8  ;;  %v4288_v0 = vpop.eup %3619 }
 0x605   :  { %v2622_v14 = vrot.slane %v2615_v12, %v4043_v10  ;;  %v2630_v16 = vrot.slane %v3328_v41, %v4043_v10  ;;  %v1472_v17 = vcombine.low %v1463_v38, %v1471_v11  ;;  %v1452_v57 = vpack.c.bf16 %v4270_v29, %v4270_v29 }
 0x606   :  { %v1488_v18 = vrot.slane %v1481_v39, %v4043_v10  ;;  %v1496_v20 = vrot.slane %v3313_v13, %v4043_v10  ;;  %v2640_v56 = vcombine.low %v722_v30, %v729_v31  ;;  %v3329_v22 = vcombine.high %v722_v30, %v729_v31 }
 0x607   :  { %v1479_v25 = vrot.slane %v1472_v17, %v4048_v19  ;;  %v2631_v27 = vcombine.low %v2622_v14, %v2630_v16  ;;  %v1453_v11 = vpack.c.bf16 %v4288_v0, %v4288_v0 }
 0x608   :  { %v2647_v36 = vrot.slane %v2640_v56, %v4043_v10  ;;  %v2655_v23 = vrot.slane %v3329_v22, %v4043_v10  ;;  %v1497_v24 = vcombine.low %v1488_v18, %v1496_v20 }
 0x609   :  { %v1480_v32 = vcombine.high %v1479_v25, %v3837_v6  ;;  %v4277_v26 = vrot.slane %v2631_v27, %v4048_v19  ;;  %v1509_v45 = vshrl.u32 %v1479_v25, 16 }
 0x60a   :  { %v1504_v34 = vrot.slane %v1497_v24, %v4048_v19  ;;  %v2656_v44 = vcombine.low %v2647_v36, %v2655_v23 }
 0x60b   :  { %v1515_v37 = vshrl.u32 %v1480_v32, 16  ;;  %v4285_v58 = vcombine.high %v4277_v26, %v3837_v6  ;;  %v2668_v2 = vshrl.u32 %v4277_v26, 16 }
 0x60c   :  { %v1508_v48 = vpack.i.b16 %v1504_v34, %v1479_v25  ;;  %v1510_v50 = vshrl.u32 %v1504_v34, 16  ;;  %v1505_v51 = vcombine.high %v1504_v34, %v3837_v6  ;;  %v4281_v52 = vrot.slane %v2656_v44, %v4048_v19 }
 0x60d   :  { %v2674_v8 = vshrl.u32 %v4285_v58, 16 }
 0x60e   :  { %v1522_v60 = vsel %vm1234_vm6, %v1508_v48, 0  ;;  %v1511_v61 = vpack.i.b16 %v1510_v50, %v1509_v45  ;;  %v1514_v63 = vpack.i.b16 %v1505_v51, %v1480_v32  ;;  %v1516_v54 = vshrl.u32 %v1505_v51, 16 }
 0x60f   :  { %3443 = vmatpush3.bf16.msra.mxu0 %v1522_v60  ;;  %v2669_v3 = vshrl.u32 %v4281_v52, 16  ;;  %v2667_v62 = vpack.i.b16 %v4281_v52, %v4277_v26  ;;  %v4296_v7 = vcombine.high %v4281_v52, %v3837_v6 }
 0x610   :  { %v1568_v49 = vsel %vm1234_vm6, %v1511_v61, 0  ;;  %3454 = vmatprep.subr.bf16.mxu0 %v3829_v15  ;;  %v1517_v53 = vpack.i.b16 %v1516_v54, %v1515_v37  ;;  %v1614_v38 = vsel %vm1234_vm6, %v1514_v63, 0 }
 0x611   :  { %3449 = vmatpush3.bf16.msra.mxu1 %v1568_v49  ;;  %v4302_v59 = vpack.i.b16 %v2669_v3, %v2668_v2  ;;  %v2675_v9 = vshrl.u32 %v4296_v7, 16  ;;  %v2673_v35 = vpack.i.b16 %v4296_v7, %v4285_v58  ;;  %v2681_v55 = vsel %vm1234_vm6, %v2667_v62, 0 }
 0x612   :  { %3445 = vmatmul.mubr.msk.bf16.vlgmr.msra.gmra.mrb[12].mxu0 %vm1230_vm7, %v1452_v57  ;;  %3460 = vmatprep.subr.bf16.mxu1 %v3829_v15  ;;  %v1660_v41 = vsel %vm1234_vm6, %v1517_v53, 0 }
 0x613   :  { %3455 = vmatpush3.bf16.msra.mxu0 %v1614_v38  ;;  %3456 = vmatprep.mubr.msk.bf16.mxu0 %vm3830_vm1, %v3829_v15  ;;  %v4315_v12 = vpack.i.b16 %v2675_v9, %v2674_v8  ;;  %v2727_v28 = vsel %vm1234_vm6, %v4302_v59, 0 }
 0x614   :  { %3451 = vmatmul.mubr.msk.bf16.vlgmr.msra.gmra.mrb[8].mxu1 %vm1230_vm7, %v1453_v11  ;;  %3466 = vmatprep.subr.bf16.mxu0 %v3829_v15 }
 0x615   :  { %3461 = vmatpush3.bf16.msra.mxu1 %v1660_v41  ;;  %3462 = vmatprep.mubr.msk.bf16.mxu1 %vm3830_vm1, %v3829_v15 }
 0x616   :  { %3472 = vmatprep.subr.bf16.mxu1 %v3829_v15 }
 0x627   :  { %v1424_v30 = vpop.xlane.xlu0 %1423 }
 0x628   :  { %v1430_v31 = vsub.f32 %v4214_v4, %v1424_v30 }
 0x629   :  { %v1427_v39 = vpop.xlane.xlu1 %1426 }
 0x62a   :  { %v1436_v13 = vmul.f32 1.442695, %v1430_v31  ;;  %v1431_v14 = vsub.f32 %v4216_v5, %v1427_v39 }
 0x62c   :  { %3621 = vpow2.f32 %v1436_v13  ;;  %v1438_v16 = vmul.f32 1.442695, %v1431_v14 }
 0x62d   :  { %v1981_v17 = vpop.trf.xlu0 }
 0x62e   :  { %3623 = vpow2.f32 %v1438_v16 }
 0x62f   :  { %v1997_v18 = vpop.trf.xlu1 }
 0x631   :  { %v2013_v20 = vpop.trf.xlu0 }
 0x633   :  { %v2061_v56 = vpop.trf.xlu1 }
 0x634   :  { %v2135_v36 = vcombine.low %v1997_v18, %v2061_v56  ;;  %v1440_v18 = vsel %vm1230_vm7, %v4270_v29, 0.0 }
 0x635   :  { %v2029_v22 = vpop.trf.xlu0 }
 0x636   :  { %v4325_v25 = vpop.eup %3621  ;;  %v2142_v44 = vrot.slane %v2135_v36, %v4043_v10 }
 0x637   :  { %v2093_v23 = vpop.trf.xlu1  ;;  %v1454_v24 = vpack.c.bf16 %v4325_v25, %v4325_v25 }
 0x638   :  { %v3624_v4 = vpop.eup %3623  ;;  %v2143_v27 = vcombine.low %v2029_v22, %v2093_v23  ;;  %v740_v22 = vld [vmem:[%s4587_s8] sm:$0xf]  ;;  %v741_v23 = vld [vmem:[%s4587_s8 + $0x4] sm:$0xf] }
 0x639   :  { %3457 = vmatmul.mubr.msk.bf16.vlgmr.msra.gmra.mrb[16].mxu0 %vm1230_vm7, %v1454_v24  ;;  %v2045_v5 = vpop.trf.xlu0  ;;  %v1455_v32 = vpack.c.bf16 %v3624_v4, %v3624_v4  ;;  %v1449_v56 = vsel %vm1230_vm7, %v3624_v4, 0.0  ;;  %v4354_v36 = vsel %vm1234_vm6, %v740_v22, 0  ;;  %v4361_v29 = vsel %vm1234_vm6, %v741_v23, 0 }
 0x63a   :  { %v2150_v34 = vrot.slane %v2143_v27, %v4043_v10  ;;  %3468 = vmatprep.mubr.msk.bf16.mxu0 %vm3830_vm1, %v3829_v15  ;;  %v2101_v45 = vcombine.low %v1981_v17, %v2045_v5  ;;  %3467 = vmatpush3.bf16.msra.mxu0 %v4354_v36 }
 0x63b   :  { %3463 = vmatmul.mubr.msk.bf16.vlgmr.msra.gmra.mrb[12].mxu1 %vm1230_vm7, %v1455_v32  ;;  %3478 = vmatprep.subr.bf16.mxu0 %v3829_v15 }
 0x63c   :  { %3474 = vmatprep.mubr.msk.bf16.mxu1 %vm3830_vm1, %v3829_v15  ;;  %v2151_v48 = vcombine.low %v2142_v44, %v2150_v34  ;;  %v2108_v37 = vrot.slane %v2101_v45, %v4043_v10  ;;  %v2152_v3 = vcombine.high %v2142_v44, %v2150_v34  ;;  %3473 = vmatpush3.bf16.msra.mxu1 %v4361_v29  ;;  %v1446_v34 = vsel %vm1230_vm7, %v4325_v25, 0.0 }
 0x63d   :  { %v2077_v50 = vpop.trf.xlu0  ;;  %3484 = vmatprep.subr.bf16.mxu1 %v3829_v15 }
 0x63e   :  { %v2109_v51 = vcombine.low %v2013_v20, %v2077_v50  ;;  %v2159_v61 = vrot.slane %v2151_v48, %v4048_v19  ;;  %v2166_v30 = vrot.slane %v2152_v3, %v4048_v19  ;;  %v1443_v20 = vsel %vm1230_vm7, %v4288_v0, 0.0 }
 0x640   :  { %v2116_v60 = vrot.slane %v2109_v51, %v4043_v10  ;;  %v2174_v49 = vshrl.u32 %v2159_v61, 16  ;;  %v2167_v9 = vcombine.high %v2159_v61, %v3837_v6  ;;  %v2190_v16 = vshrl.u32 %v2166_v30, 16 }
 0x641   :  { %v2168_v4 = vcombine.high %v2166_v30, %v3837_v6 }
 0x642   :  { %v2117_v63 = vcombine.low %v2108_v37, %v2116_v60  ;;  %v2118_v54 = vcombine.high %v2108_v37, %v2116_v60  ;;  %v2182_v39 = vshrl.u32 %v2167_v9, 16 }
 0x643   :  { %v2198_v5 = vshrl.u32 %v2168_v4, 16 }
 0x644   :  { %v2125_v2 = vrot.slane %v2117_v63, %v4048_v19  ;;  %v2132_v38 = vrot.slane %v2118_v54, %v4048_v19 }
 0x646   :  { %v2171_v57 = vpack.i.b16 %v2159_v61, %v2125_v2  ;;  %v2173_v53 = vshrl.u32 %v2125_v2, 16  ;;  %v2133_v8 = vcombine.high %v2125_v2, %v3837_v6  ;;  %v2189_v14 = vshrl.u32 %v2132_v38, 16 }
 0x647   :  { %v2187_v0 = vpack.i.b16 %v2166_v30, %v2132_v38  ;;  %v2134_v24 = vcombine.high %v2132_v38, %v3837_v6 }
 0x648   :  { %2201 = vxpose.xlu0.c.b16.start.end [1/1] (short) (narrow) %v2171_v57, 16  ;;  %v2175_v11 = vpack.i.b16 %v2174_v49, %v2173_v53  ;;  %v2181_v41 = vshrl.u32 %v2133_v8, 16  ;;  %v2179_v31 = vpack.i.b16 %v2167_v9, %v2133_v8  ;;  %v2191_v17 = vpack.i.b16 %v2190_v16, %v2189_v14  ;;  %v742_v9 = vld [vmem:[%s4587_s8 + $0x8] sm:$0xf]  ;;  %v743_v16 = vld [vmem:[%s4587_s8 + $0xc] sm:$0xf] }
 0x649   :  { %v2197_v27 = vshrl.u32 %v2134_v24, 16  ;;  %v2195_v44 = vpack.i.b16 %v2168_v4, %v2134_v24  ;;  %v4389_v22 = vsel %vm1234_vm6, %v743_v16, 0 }
 0x64a   :  { %2217 = vxpose.xlu1.c.b16.start.end [1/1] (short) (narrow) %v2175_v11, 16  ;;  %v2183_v13 = vpack.i.b16 %v2182_v39, %v2181_v41 }
 0x64b   :  { %v2199_v32 = vpack.i.b16 %v2198_v5, %v2197_v27 }
 0x64c   :  { %2233 = vxpose.xlu0.c.b16.start.end [1/1] (short) (narrow) %v2179_v31, 16  ;;  %v4376_v31 = vsel %vm1234_vm6, %v742_v9, 0 }
 0x64e   :  { %2249 = vxpose.xlu1.c.b16.start.end [1/1] (short) (narrow) %v2183_v13, 16 }
 0x652   :  { %2281 = vxpose.xlu1.c.b16.start.end [1/1] (short) (narrow) %v2191_v17, 16 }
 0x659   :  { %1441 = vadd.xlane.f32.xlu0 %v1440_v18 }
 0x65f   :  { %1444 = vadd.xlane.f32.xlu1 %v1443_v20 }
 0x663   :  { %1450 = vadd.xlane.f32.xlu1 %v1449_v56 }
 0x686   :  { %2265 = vxpose.xlu0.c.b16.start.end [1/1] (short) (narrow) %v2187_v0, 16 }
 0x690   :  { %2313 = vxpose.xlu1.c.b16.start.end [1/1] (short) (narrow) %v2199_v32, 16 }
 0x693   :  { %1447 = vadd.xlane.f32.xlu0 %v1446_v34 }
 0x6ae   :  { %v4370_v48 = vpop.trf.xlu0 }
 0x6b0   :  { %v2225_v45 = vpop.trf.xlu1 }
 0x6b2   :  { %v2241_v51 = vpop.trf.xlu0 }
 0x6b4   :  { %v2257_v50 = vpop.trf.xlu1 }
 0x6b8   :  { %v2289_v37 = vpop.trf.xlu1 }
 0x6b9   :  { %v2354_v41 = vcombine.low %v2225_v45, %v2289_v37 }
 0x6bb   :  { %v2361_v14 = vrot.slane %v2354_v41, %v4043_v10 }
 0x6c0   :  { %2297 = vxpose.xlu0.c.b16.start.end [1/1] (short) (narrow) %v2195_v44, 16 }
 0x6e5   :  { %v1558_v60 = vpop.f32.mrb[12].mxu0 }
 0x6e6   :  { %v1442_v61 = vpop.xlane.xlu0 %1441  ;;  %v3446_v63 = vpop.f32.mrb[13].mxu0 }
 0x6e7   :  { %3625 = vrcp.f32 %v1442_v61  ;;  %v1604_v54 = vpop.f32.mrb[8].mxu1  ;;  %v1561_v2 = vpop.f32.mrb[14].mxu0 }
 0x6e8   :  { %v3447_v3 = vpop.f32.mrb[15].mxu0  ;;  %v3452_v49 = vpop.f32.mrb[9].mxu1 }
 0x6e9   :  { %v1607_v57 = vpop.f32.mrb[10].mxu1 }
 0x6ea   :  { %v3453_v53 = vpop.f32.mrb[11].mxu1 }
 0x6ec   :  { %v1445_v25 = vpop.xlane.xlu1 %1444 }
 0x6ed   :  { %3627 = vrcp.f32 %v1445_v25 }
 0x6f0   :  { %v1451_v11 = vpop.xlane.xlu1 %1450 }
 0x6f1   :  { %v3626_v8 = vpop.eup %3625  ;;  %3629 = vrcp.f32 %v1451_v11 }
 0x6f2   :  { %v1706_v38 = vmul.f32 %v3626_v8, %v1558_v60  ;;  %v2273_v60 = vpop.trf.xlu0 }
 0x6f3   :  { %v2329_v63 = vcombine.low %v4370_v48, %v2273_v60 }
 0x6f4   :  { %v1710_v30 = vpack.c.bf16 %v1706_v38, %v1706_v38 }
 0x6f5   :  { %v2336_v49 = vrot.slane %v2329_v63, %v4043_v10 }
 0x6f6   :  { %3469 = vmatmul.mubr.msk.bf16.vlgmr.msra.gmra.mrb[20].mxu0 %vm1230_vm7, %v1710_v30  ;;  %v2321_v39 = vpop.trf.xlu1 }
 0x6f7   :  { %v3628_v13 = vpop.eup %3627  ;;  %v2362_v17 = vcombine.low %v2257_v50, %v2321_v39  ;;  %3479 = vmatpush3.bf16.msra.mxu0 %v4376_v31  ;;  %3480 = vmatprep.mubr.msk.bf16.mxu0 %vm3830_vm1, %v3829_v15 }
 0x6f8   :  { %v1707_v18 = vmul.f32 %v3628_v13, %v1604_v54  ;;  %3490 = vmatprep.subr.bf16.mxu0 %v3829_v15 }
 0x6f9   :  { %v2369_v20 = vrot.slane %v2362_v17, %v4043_v10 }
 0x6fa   :  { %v1711_v56 = vpack.c.bf16 %v1707_v18, %v1707_v18 }
 0x6fb   :  { %v2370_v23 = vcombine.low %v2361_v14, %v2369_v20  ;;  %v3630_v4 = vpop.eup %3629 }
 0x6fc   :  { %3475 = vmatmul.mubr.msk.bf16.vlgmr.msra.gmra.mrb[16].mxu1 %vm1230_vm7, %v1711_v56 }
 0x6fd   :  { %3485 = vmatpush3.bf16.msra.mxu1 %v4389_v22  ;;  %3486 = vmatprep.mubr.msk.bf16.mxu1 %vm3830_vm1, %v3829_v15  ;;  %v2377_v3 = vrot.slane %v2370_v23, %v4048_v19 }
 0x6fe   :  { %3496 = vmatprep.subr.bf16.mxu1 %v3829_v15 }
 0x6ff   :  { %v2378_v9 = vcombine.high %v2377_v3, %v3837_v6  ;;  %v2383_v39 = vshrl.u32 %v2377_v3, 16 }
 0x70c   :  { %v1650_v0 = vpop.f32.mrb[16].mxu0 }
 0x70d   :  { %v3458_v24 = vpop.f32.mrb[17].mxu0 }
 0x70e   :  { %v1653_v27 = vpop.f32.mrb[18].mxu0  ;;  %v1696_v5 = vpop.f32.mrb[12].mxu1 }
 0x70f   :  { %v1709_v32 = vmul.f32 %v3630_v4, %v1696_v5  ;;  %v3459_v34 = vpop.f32.mrb[19].mxu0  ;;  %v3464_v44 = vpop.f32.mrb[13].mxu1  ;;  %v735_v4 = vld [vmem:[%s4580_s1 + $0x1] sm:$0x1] }
 0x710   :  { %v1699_v45 = vpop.f32.mrb[14].mxu1  ;;  %vm737_vm9 = vcmp.eq.f32.partialorder %v735_v4, 0.0  ;;  %v2773_v4 = vsel %vm1234_vm6, %v2673_v35, 0 }
 0x711   :  { %v1713_v50 = vpack.c.bf16 %v1709_v32, %v1709_v32  ;;  %v3465_v37 = vpop.f32.mrb[15].mxu1  ;;  %v739_v34 = vsel %vm737_vm9, -1e+09, %v3829_v15 }
 0x713   :  { %3487 = vmatmul.mubr.msk.bf16.vlgmr.msra.gmra.mrb[20].mxu1 %vm1230_vm7, %v1713_v50 }
 0x714   :  { %3498 = vmatprep.mubr.msk.bf16.mxu1 %vm3830_vm1, %v3829_v15 }
 0x720   :  { %v1448_v61 = vpop.xlane.xlu0 %1447 }
 0x721   :  { %3631 = vrcp.f32 %v1448_v61  ;;  %v1909_v61 = vrot.slane %v739_v34, %v747_v21  ;;  %v3657_v34 = vld [vmem:[%s4579_s0] sm:$0xff] }
 0x726   :  { %v2305_v54 = vpop.trf.xlu0 }
 0x727   :  { %v2337_v2 = vcombine.low %v2241_v51, %v2305_v54  ;;  %v2389_v51 = vshrl.u32 %v2378_v9, 16 }
 0x729   :  { %v2344_v57 = vrot.slane %v2337_v2, %v4043_v10 }
 0x72b   :  { %v3632_v53 = vpop.eup %3631  ;;  %v2345_v25 = vcombine.low %v2336_v49, %v2344_v57 }
 0x72c   :  { %v1708_v8 = vmul.f32 %v3632_v53, %v1650_v0 }
 0x72d   :  { %v2352_v38 = vrot.slane %v2345_v25, %v4048_v19 }
 0x72e   :  { %v1712_v11 = vpack.c.bf16 %v1708_v8, %v1708_v8 }
 0x72f   :  { %v2381_v41 = vpack.i.b16 %v2377_v3, %v2352_v38  ;;  %v2382_v30 = vshrl.u32 %v2352_v38, 16  ;;  %v2353_v48 = vcombine.high %v2352_v38, %v3837_v6 }
 0x730   :  { %3481 = vmatmul.mubr.msk.bf16.vlgmr.msra.gmra.mrb[24].mxu0 %vm1230_vm7, %v1712_v11 }
 0x731   :  { %v2395_v13 = vsel %vm1234_vm6, %v2381_v41, 0  ;;  %v2384_v14 = vpack.i.b16 %v2383_v39, %v2382_v30  ;;  %3492 = vmatprep.mubr.msk.bf16.mxu0 %vm3830_vm1, %v3829_v15  ;;  %v2387_v10 = vpack.i.b16 %v2378_v9, %v2353_v48  ;;  %v2388_v16 = vshrl.u32 %v2353_v48, 16 }
 0x732   :  { %3491 = vmatpush3.bf16.msra.mxu0 %v2395_v13 }
 0x733   :  { %v2441_v19 = vsel %vm1234_vm6, %v2384_v14, 0  ;;  %3502 = vmatprep.subr.bf16.mxu0 %v3829_v15  ;;  %v2390_v17 = vpack.i.b16 %v2389_v51, %v2388_v16  ;;  %v2487_v18 = vsel %vm1234_vm6, %v2387_v10, 0 }
 0x734   :  { %3497 = vmatpush3.bf16.msra.mxu1 %v2441_v19 }
 0x735   :  { %3508 = vmatprep.subr.bf16.mxu1 %v3829_v15  ;;  %v2533_v6 = vsel %vm1234_vm6, %v2390_v17, 0 }
 0x737   :  { %3499 = vmatmul.mubr.msk.bf16.vlgmr.msra.gmra.mrb[24].mxu1 %vm1230_vm7, %v4145_v43 }
 0x738   :  { %3493 = vmatmul.mubr.msk.bf16.vlgmr.msra.gmra.mrb[28].mxu0 %vm1230_vm7, %v1963_v40  ;;  %3509 = vmatpush3.bf16.msra.mxu1 %v2533_v6 }
 0x739   :  { %3503 = vmatpush3.bf16.msra.mxu0 %v2487_v18  ;;  %3510 = vmatprep.mubr.msk.bf16.mxu1 %vm3830_vm1, %v3829_v15 }
 0x73a   :  { %3520 = vmatprep.subr.bf16.mxu1 %v3829_v15  ;;  %3504 = vmatprep.mubr.msk.bf16.mxu0 %vm3830_vm1, %v3829_v15 }
 0x73b   :  { %3514 = vmatprep.subr.bf16.mxu0 %v3829_v15 }
 0x73f   :  { %3511 = vmatmul.mubr.msk.bf16.vlgmr.msra.gmra.mrb[28].mxu1 %vm1230_vm7, %v4151_v47 }
 0x740   :  { %3521 = vmatpush3.bf16.msra.mxu1 %v2727_v28  ;;  %3505 = vmatmul.mubr.msk.bf16.vlgmr.msra.gmra.mrb[32].mxu0 %vm1230_vm7, %v1969_v46 }
 0x741   :  { %3515 = vmatpush3.bf16.msra.mxu0 %v2681_v55  ;;  %3522 = vmatprep.mubr.msk.bf16.mxu1 %vm3830_vm1, %v3829_v15 }
 0x742   :  { %3532 = vmatprep.subr.bf16.mxu1 %v3829_v15  ;;  %3516 = vmatprep.mubr.msk.bf16.mxu0 %vm3830_vm1, %v3829_v15 }
 0x743   :  { %3526 = vmatprep.subr.bf16.mxu0 %v3829_v15 }
 0x7c9   :  { %v1754_v40 = vpop.f32.mrb[20].mxu0 }
 0x7ca   :  { %v3470_v33 = vpop.f32.mrb[21].mxu0  ;;  %v1898_v47 = vsel %vm123_vm0, %v1754_v40, 0.0 }
 0x7cb   :  { %v1757_v42 = vpop.f32.mrb[22].mxu0 }
 0x7cc   :  { %v3471_v43 = vpop.f32.mrb[23].mxu0 }
 0x7cf   :  { %v1800_v46 = vpop.f32.mrb[16].mxu1 }
 0x7d0   :  { %v1899_v26 = vsel %vm123_vm0, %v1800_v46, 0.0  ;;  %v3476_v52 = vpop.f32.mrb[17].mxu1 }
 0x7d1   :  { %v1900_v62 = vadd.f32 %v1899_v26, %v1898_v47  ;;  %v1803_v59 = vpop.f32.mrb[18].mxu1 }
 0x7d2   :  { %v3477_v20 = vpop.f32.mrb[19].mxu1 }
 0x7e6   :  { %v1892_v56 = vpop.f32.mrb[20].mxu1 }
 0x7e7   :  { %v3488_v23 = vpop.f32.mrb[21].mxu1  ;;  %v1903_v50 = vsel %vm123_vm0, %v1892_v56, 0.0 }
 0x7e8   :  { %v1895_v0 = vpop.f32.mrb[22].mxu1 }
 0x7e9   :  { %v3489_v24 = vpop.f32.mrb[23].mxu1  ;;  %v4461_v0 = vld [vmem:[#allocation11] ss:$0 sm:$0xff] }
 0x7ea   :  { %v2819_v24 = vsel %vm1234_vm6, %v4315_v12, 0 }
 0x803   :  { %v1846_v27 = vpop.f32.mrb[24].mxu0 }
 0x804   :  { %v1901_v5 = vsel %vm123_vm0, %v1846_v27, 0.0  ;;  %v3482_v32 = vpop.f32.mrb[25].mxu0 }
 0x805   :  { %v1902_v44 = vadd.f32 %v1901_v5, %v1900_v62  ;;  %v1849_v45 = vpop.f32.mrb[26].mxu0 }
 0x806   :  { %v3483_v37 = vpop.f32.mrb[27].mxu0 }
 0x807   :  { %v1904_v60 = vadd.f32 %v1903_v50, %v1902_v44 }
 0x809   :  { %v3059_v27 = vadd.f32 %v4461_v0, %v1904_v60 }
 0x80a   :  { %v2477_v63 = vpop.f32.mrb[24].mxu1 }
 0x80b   :  { %v2478_v54 = vadd.f32 %v2477_v63, %v1909_v61  ;;  %v2431_v2 = vpop.f32.mrb[28].mxu0  ;;  %v3500_v3 = vpop.f32.mrb[25].mxu1  ;;  %v4483_v44 = vadd.f32 %v3657_v34, %v3059_v27 }
 0x80c   :  { %v2432_v49 = vadd.f32 %v2431_v2, %v1909_v61  ;;  %v3494_v57 = vpop.f32.mrb[29].mxu0  ;;  %v2480_v53 = vpop.f32.mrb[26].mxu1 }
 0x80d   :  { %v2434_v25 = vpop.f32.mrb[30].mxu0  ;;  %v3501_v8 = vpop.f32.mrb[27].mxu1  ;;  %v2578_v9 = vsel %vm1230_vm7, %v2478_v54, -inf  ;;  %v3065_v45 = vsel %vm123_vm0, %v4483_v44, 0.0 }
 0x80e   :  { %2579 = vmax.xlane.f32.xlu1 %v2578_v9  ;;  %v3495_v38 = vpop.f32.mrb[31].mxu0  ;;  %v2575_v11 = vsel %vm1230_vm7, %v2432_v49, -inf }
 0x80f   :  { %2576 = vmax.xlane.f32.xlu0 %v2575_v11 }
 0x812   :  { %v2569_v41 = vpop.f32.mrb[28].mxu1 }
 0x813   :  { %v2570_v30 = vadd.f32 %v2569_v41, %v1909_v61  ;;  %v2523_v1 = vpop.f32.mrb[32].mxu0  ;;  %v3512_v21 = vpop.f32.mrb[29].mxu1 }
 0x814   :  { %v2524_v39 = vadd.f32 %v2523_v1, %v1909_v61  ;;  %v3506_v48 = vpop.f32.mrb[33].mxu0  ;;  %v2572_v51 = vpop.f32.mrb[30].mxu1 }
 0x815   :  { %v2526_v13 = vpop.f32.mrb[34].mxu0  ;;  %v3513_v14 = vpop.f32.mrb[31].mxu1  ;;  %v2584_v10 = vsel %vm1230_vm7, %v2570_v30, -inf }
 0x816   :  { %2585 = vmax.xlane.f32.xlu1 %v2584_v10  ;;  %v3507_v16 = vpop.f32.mrb[35].mxu0  ;;  %v2581_v19 = vsel %vm1230_vm7, %v2524_v39, -inf }
 0x817   :  { %2582 = vmax.xlane.f32.xlu0 %v2581_v19 }
 0x89b   :  { %v2580_v17 = vpop.xlane.xlu1 %2579 }
 0x89c   :  { %v2588_v6 = vsub.f32 %v2478_v54, %v2580_v17  ;;  %v2577_v18 = vpop.xlane.xlu0 %2576 }
 0x89d   :  { %v2587_v28 = vsub.f32 %v2432_v49, %v2577_v18 }
 0x89e   :  { %v2593_v55 = vmul.f32 1.442695, %v2588_v6 }
 0x89f   :  { %v2591_v40 = vmul.f32 1.442695, %v2587_v28 }
 0x8a0   :  { %3633 = vpow2.f32 %v2593_v55 }
 0x8a1   :  { %3635 = vpow2.f32 %v2591_v40 }
 0x8a3   :  { %v2586_v33 = vpop.xlane.xlu1 %2585 }
 0x8a4   :  { %v2590_v42 = vsub.f32 %v2570_v30, %v2586_v33  ;;  %v2583_v43 = vpop.xlane.xlu0 %2582 }
 0x8a5   :  { %v2589_v46 = vsub.f32 %v2524_v39, %v2583_v43 }
 0x8a6   :  { %v2597_v47 = vmul.f32 1.442695, %v2590_v42 }
 0x8a7   :  { %v2595_v26 = vmul.f32 1.442695, %v2589_v46 }
 0x8a8   :  { %3637 = vpow2.f32 %v2597_v47 }
 0x8a9   :  { %3639 = vpow2.f32 %v2595_v26 }
 0x8aa   :  { %v3634_v52 = vpop.eup %3633 }
 0x8ab   :  { %v3636_v62 = vpop.eup %3635  ;;  %v2602_v59 = vsel %vm1230_vm7, %v3634_v52, 0.0  ;;  %v2612_v20 = vpack.c.bf16 %v3634_v52, %v3634_v52 }
 0x8ac   :  { %2603 = vadd.xlane.f32.xlu1 %v2602_v59  ;;  %v2599_v56 = vsel %vm1230_vm7, %v3636_v62, 0.0  ;;  %v2611_v23 = vpack.c.bf16 %v3636_v62, %v3636_v62 }
 0x8ad   :  { %3523 = vmatmul.mubr.msk.bf16.vlgmr.msra.gmra.mrb[32].mxu1 %vm1230_vm7, %v2612_v20  ;;  %2600 = vadd.xlane.f32.xlu0 %v2599_v56 }
 0x8ae   :  { %3533 = vmatpush3.bf16.msra.mxu1 %v2819_v24  ;;  %3517 = vmatmul.mubr.msk.bf16.vlgmr.msra.gmra.mrb[36].mxu0 %vm1230_vm7, %v2611_v23 }
 0x8af   :  { %3527 = vmatpush3.bf16.msra.mxu0 %v2773_v4  ;;  %3534 = vmatprep.mubr.msk.bf16.mxu1 %vm3830_vm1, %v3829_v15 }
 0x8b0   :  { %3528 = vmatprep.mubr.msk.bf16.mxu0 %vm3830_vm1, %v3829_v15  ;;  %3544 = vmatprep.subr.bf16.mxu1 %v3829_v15 }
 0x8b1   :  { %3538 = vmatprep.subr.bf16.mxu0 %v3829_v15 }
 0x8b2   :  { %v3638_v12 = vpop.eup %3637 }
 0x8b3   :  { %v3640_v5 = vpop.eup %3639  ;;  %v2608_v32 = vsel %vm1230_vm7, %v3638_v12, 0.0  ;;  %v2614_v58 = vpack.c.bf16 %v3638_v12, %v3638_v12 }
 0x8b4   :  { %2609 = vadd.xlane.f32.xlu1 %v2608_v32  ;;  %v2605_v7 = vsel %vm1230_vm7, %v3640_v5, 0.0  ;;  %v2613_v35 = vpack.c.bf16 %v3640_v5, %v3640_v5 }
 0x8b5   :  { %3535 = vmatmul.mubr.msk.bf16.vlgmr.msra.gmra.mrb[36].mxu1 %vm1230_vm7, %v2614_v58  ;;  %2606 = vadd.xlane.f32.xlu0 %v2605_v7 }
 0x8b6   :  { %3529 = vmatmul.mubr.msk.bf16.vlgmr.msra.gmra.mrb[40].mxu0 %vm1230_vm7, %v2613_v35  ;;  %3545 = vmatpush3.bf16.msra.mxu1 %v4361_v29 }
 0x8b7   :  { %3539 = vmatpush3.bf16.msra.mxu0 %v4354_v36  ;;  %3546 = vmatprep.mubr.msk.bf16.mxu1 %vm3830_vm1, %v3829_v15 }
 0x8b8   :  { %3540 = vmatprep.mubr.msk.bf16.mxu0 %vm3830_vm1, %v3829_v15  ;;  %3556 = vmatprep.subr.bf16.mxu1 %v3829_v15 }
 0x8b9   :  { %3066 = vadd.xlane.f32.xlu0 %v3065_v45  ;;  %3550 = vmatprep.subr.bf16.mxu0 %v3829_v15 }
 0x939   :  { %v2604_v54 = vpop.xlane.xlu1 %2603 }
 0x93a   :  { %v2601_v50 = vpop.xlane.xlu0 %2600  ;;  %3641 = vrcp.f32 %v2604_v54 }
 0x93b   :  { %3643 = vrcp.f32 %v2601_v50  ;;  %v3658_v50 = vld [vmem:[%s4579_s0 + $0x8] sm:$0xff] }
 0x941   :  { %v2610_v2 = vpop.xlane.xlu1 %2609 }
 0x942   :  { %v2607_v37 = vpop.xlane.xlu0 %2606  ;;  %3645 = vrcp.f32 %v2610_v2 }
 0x943   :  { %3647 = vrcp.f32 %v2607_v37 }
 0x944   :  { %v3642_v3 = vpop.eup %3641 }
 0x945   :  { %v3644_v57 = vpop.eup %3643 }
 0x946   :  { %v3067_v60 = vpop.xlane.xlu0 %3066 }
 0x947   :  { %v3071_v29 = vmul.f32 0.03125, %v3067_v60 }
 0x949   :  { %v4498_v36 = vsub.f32 %v4483_v44, %v3071_v29 }
 0x94b   :  { %v3075_v61 = vmul.f32 %v4498_v36, %v4498_v36 }
 0x94c   :  { %v3646_v48 = vpop.eup %3645 }
 0x94d   :  { %v3077_v63 = vsel %vm123_vm0, %v3075_v61, 0.0  ;;  %v3648_v13 = vpop.eup %3647 }
 0x94e   :  { %3078 = vadd.xlane.f32.xlu0 %v3077_v63 }
 0x980   :  { %v2763_v49 = vpop.f32.mrb[32].mxu1 }
 0x981   :  { %v2866_v53 = vmul.f32 %v3642_v3, %v2763_v49  ;;  %v2717_v25 = vpop.f32.mrb[36].mxu0  ;;  %v3524_v8 = vpop.f32.mrb[33].mxu1  ;;  %v3604_v3 = vld [vmem:[%s4589_s10 + $0x8] sm:$0xff]   ;;  %v3605_v49 = vld [vmem:[%s4591_s12] sm:$0xff]  }
 0x982   :  { %v2865_v9 = vmul.f32 %v3644_v57, %v2717_v25  ;;  %v3518_v38 = vpop.f32.mrb[37].mxu0  ;;  %v2766_v11 = vpop.f32.mrb[34].mxu1  ;;  %v3606_v57 = vld [vmem:[%s4591_s12 + $0x8] sm:$0xff]  }
 0x983   :  { %v2870_v41 = vpack.c.bf16 %v2866_v53, %v2866_v53  ;;  %v2720_v30 = vpop.f32.mrb[38].mxu0  ;;  %v3525_v1 = vpop.f32.mrb[35].mxu1 }
 0x984   :  { %v2869_v21 = vpack.c.bf16 %v2865_v9, %v2865_v9  ;;  %v3519_v39 = vpop.f32.mrb[39].mxu0 }
 0x985   :  { %3547 = vmatmul.mubr.msk.bf16.vlgmr.msra.gmra.mrb[40].mxu1 %vm1230_vm7, %v2870_v41 }
 0x986   :  { %3541 = vmatmul.mubr.msk.bf16.vlgmr.msra.gmra.mrb[44].mxu0 %vm1230_vm7, %v2869_v21  ;;  %3557 = vmatpush3.bf16.msra.mxu1 %v4389_v22 }
 0x987   :  { %3551 = vmatpush3.bf16.msra.mxu0 %v4376_v31  ;;  %3558 = vmatprep.mubr.msk.bf16.mxu1 %vm3830_vm1, %v3829_v15 }
 0x988   :  { %v2855_v51 = vpop.f32.mrb[36].mxu1  ;;  %3552 = vmatprep.mubr.msk.bf16.mxu0 %vm3830_vm1, %v3829_v15  ;;  %3562 = vmatprep.subr.bf16.mxu0 %v3829_v15 }
 0x989   :  { %v2868_v14 = vmul.f32 %v3646_v48, %v2855_v51  ;;  %v2809_v10 = vpop.f32.mrb[40].mxu0  ;;  %v3536_v16 = vpop.f32.mrb[37].mxu1  ;;  %3570 = vmatprep.subr.bf16.mxu1 %v3829_v15 }
 0x98a   :  { %v2867_v19 = vmul.f32 %v3648_v13, %v2809_v10  ;;  %v3530_v22 = vpop.f32.mrb[41].mxu0  ;;  %v2858_v17 = vpop.f32.mrb[38].mxu1  ;;  %v3339_v16 = vld [vmem:[#allocation7] ss:$0 sm:$0xff] }
 0x98b   :  { %v2872_v31 = vpack.c.bf16 %v2868_v14, %v2868_v14  ;;  %v2812_v6 = vpop.f32.mrb[42].mxu0  ;;  %v3537_v18 = vpop.f32.mrb[39].mxu1  ;;  %v3105_v22 = vmul.f32 %v3339_v16, %v4498_v36  ;;  %v3341_v36 = vld [vmem:[%s4590_s11] ss:$0 sm:$0xff]  ;;  %s3839_s11 = smov [#allocation13]  }
 0x98c   :  { %v2871_v28 = vpack.c.bf16 %v2867_v19, %v2867_v19  ;;  %v3531_v55 = vpop.f32.mrb[43].mxu0  ;;  %v3340_v18 = vld [vmem:[#allocation8] ss:$0 sm:$0xff]  ;;  %s3285_s17 = sshll.u32 %s3839_s11, 4  ;;  %s3286_s17 = int_to_ptr.vmem [resolvable:$true] %s3285_s17 }
 0x98d   :  { %3559 = vmatmul.mubr.msk.bf16.vlgmr.msra.gmra.mrb[44].mxu1 %vm1230_vm7, %v2872_v31  ;;  %s3791_s19 = scalar_lea.vmem %s3286_s17, 256  ;;  %p3796_p7 = scmp.lt.s32.totalorder %s3286_s17, %s3286_s17 }
 0x98e   :  { %3553 = vmatmul.mubr.msk.bf16.vlgmr.msra.gmra.mrb[48].mxu0 %vm1230_vm7, %v2871_v28  ;;  %3578 = vmatprep.mubr.msk.bf16.mxu1 %vm3830_vm1, %v3829_v15  ;;  %p3792_p6 = scmp.ne.s32.totalorder %s3286_s17, %s3791_s19  ;;  %p3797_p8 = scmp.lt.s32.totalorder %s3791_s19, %s3791_s19 }
 0x98f   :  { %3566 = vmatprep.mubr.msk.bf16.mxu0 %vm3830_vm1, %v3829_v15  ;;  %3571 = vmatpush3.bf16.msra.mxu1 %v3605_v49 }
 0x990   :  { %3572 = vmatprep.subr.bf16.mxu1 %v3829_v15  ;;  %p3798_p9 = por %p3797_p8, %p3796_p7 }
 0x992   :  { %p3799_p10 = pnand %p3798_p9, %p3792_p6 }
 0x993   :  { %3573 = vmatpush3.bf16.msra.mxu1 %v3606_v57 }
 0x994   :  { %3574 = vmatprep.subr.bf16.mxu1 %v3829_v15 }
 0x9db   :  { %v3079_v53 = vpop.xlane.xlu0 %3078 }
 0x9dc   :  { %v3083_v25 = vmul.f32 0.032258064, %v3079_v53 }
 0x9de   :  { %3649 = vrsqrt.f32 %v3083_v25  ;;  %vm3087_vm10 = vcmp.eq.f32.partialorder %v3083_v25, inf  ;;  %v3090_v30 = vand.u32 2147483648, %v3083_v25  ;;  %vm3089_vm11 = vcmp.eq.f32.partialorder %v3083_v25, 0.0 }
 0x9e8   :  { %v3650_v8 = vpop.eup %3649 }
 0x9e9   :  { %v3086_v11 = vmul.f32 %v3650_v8, %v3083_v25 }
 0x9eb   :  { %v3088_v41 = vsel %vm3087_vm10, %v3083_v25, %v3086_v11 }
 0x9ec   :  { %v3091_v1 = vsel %vm3089_vm11, %v3090_v30, %v3088_v41 }
 0x9ed   :  { %v3107_v21 = vadd.f32 1e-06, %v3091_v1 }
 0xa58   :  { %v2953_v40 = vpop.f32.mrb[40].mxu1 }
 0xa59   :  { %v3046_v33 = vsel %vm123_vm0, %v2953_v40, 0.0  ;;  %v2910_v42 = vpop.f32.mrb[44].mxu0  ;;  %v3548_v43 = vpop.f32.mrb[41].mxu1 }
 0xa5a   :  { %v3045_v46 = vsel %vm123_vm0, %v2910_v42, 0.0  ;;  %v3542_v47 = vpop.f32.mrb[45].mxu0  ;;  %v2956_v26 = vpop.f32.mrb[42].mxu1  ;;  %v3607_v42 = vld [vmem:[%s4591_s12 + $0x10] sm:$0xff]   ;;  %v3608_v43 = vld [vmem:[%s4591_s12 + $0x18] sm:$0xff]  }
 0xa5b   :  { %v3047_v52 = vadd.f32 %v3046_v33, %v3045_v46  ;;  %v2913_v62 = vpop.f32.mrb[46].mxu0  ;;  %v3549_v59 = vpop.f32.mrb[43].mxu1  ;;  %3575 = vmatpush3.bf16.msra.mxu1 %v3607_v42 }
 0xa5c   :  { %v3543_v20 = vpop.f32.mrb[47].mxu0  ;;  %3576 = vmatprep.subr.bf16.mxu1 %v3829_v15 }
 0xa5f   :  { %3577 = vmatpush3.bf16.msra.mxu1 %v3608_v43 }
 0xa60   :  { %v3039_v56 = vpop.f32.mrb[44].mxu1 }
 0xa61   :  { %v2996_v23 = vpop.f32.mrb[48].mxu0  ;;  %v3560_v24 = vpop.f32.mrb[45].mxu1  ;;  %v3050_v7 = vsel %vm123_vm0, %v3039_v56, 0.0 }
 0xa62   :  { %v3048_v4 = vsel %vm123_vm0, %v2996_v23, 0.0  ;;  %v3554_v27 = vpop.f32.mrb[49].mxu0  ;;  %v3042_v12 = vpop.f32.mrb[46].mxu1 }
 0xa63   :  { %v3049_v5 = vadd.f32 %v3048_v4, %v3047_v52  ;;  %v2999_v32 = vpop.f32.mrb[50].mxu0  ;;  %v3561_v58 = vpop.f32.mrb[47].mxu1 }
 0xa64   :  { %v3555_v35 = vpop.f32.mrb[51].mxu0 }
 0xa65   :  { %v3051_v34 = vadd.f32 %v3050_v7, %v3049_v5 }
 0xa67   :  { %v3060_v45 = vadd.f32 %v4461_v0, %v3051_v34  ;;  %v3603_v0 = vld [vmem:[%s4589_s10] sm:$0xff]  }
 0xa68   :  { %3563 = vmatpush3.bf16.msra.mxu0 %v3603_v0 }
 0xa69   :  { %v4527_v37 = vadd.f32 %v3658_v50, %v3060_v45  ;;  %3564 = vmatprep.subr.bf16.mxu0 %v3829_v15  ;;  %v3345_v15 = vld [vmem:[%s4592_s13] ss:$0 sm:$0xff] }
 0xa6b   :  { %v3068_v60 = vsel %vm123_vm0, %v4527_v37, 0.0 }
 0xa6c   :  { %3069 = vadd.xlane.f32.xlu1 %v3068_v60  ;;  %3565 = vmatpush3.bf16.msra.mxu0 %v3604_v3 }
 0xaf9   :  { %v3070_v29 = vpop.xlane.xlu1 %3069 }
 0xafa   :  { %v3072_v61 = vmul.f32 0.03125, %v3070_v29 }
 0xafc   :  { %v3074_v63 = vsub.f32 %v4527_v37, %v3072_v61 }
 0xafe   :  { %v3076_v54 = vmul.f32 %v3074_v63, %v3074_v63  ;;  %v3106_v17 = vmul.f32 %v3339_v16, %v3074_v63 }
 0xb00   :  { %v3080_v2 = vsel %vm123_vm0, %v3076_v54, 0.0 }
 0xb01   :  { %3081 = vadd.xlane.f32.xlu1 %v3080_v2 }
 0xb8e   :  { %v3082_v9 = vpop.xlane.xlu1 %3081 }
 0xb8f   :  { %v3084_v38 = vmul.f32 0.032258064, %v3082_v9 }
 0xb91   :  { %3651 = vrsqrt.f32 %v3084_v38  ;;  %vm3094_vm12 = vcmp.eq.f32.partialorder %v3084_v38, inf  ;;  %v3097_v51 = vand.u32 2147483648, %v3084_v38  ;;  %vm3096_vm13 = vcmp.eq.f32.partialorder %v3084_v38, 0.0 }
 0xb92   :  { %3653 = vrcp.f32 %v3107_v21 }
 0xb9b   :  { %v3652_v39 = vpop.eup %3651 }
 0xb9c   :  { %v3093_v48 = vmul.f32 %v3652_v39, %v3084_v38  ;;  %v3654_v19 = vpop.eup %3653 }
 0xb9d   :  { %v3110_v31 = vmul.f32 %v3654_v19, %v3105_v22 }
 0xb9e   :  { %v3095_v13 = vsel %vm3094_vm12, %v3084_v38, %v3093_v48 }
 0xb9f   :  { %v3098_v14 = vsel %vm3096_vm13, %v3097_v51, %v3095_v13  ;;  %v3119_v55 = vadd.f32 %v3340_v18, %v3110_v31 }
 0xba0   :  { %v3108_v10 = vadd.f32 1e-06, %v3098_v14 }
 0xba2   :  { %3655 = vrcp.f32 %v3108_v10 }
 0xbac   :  { %v3656_v6 = vpop.eup %3655 }
 0xbad   :  { %v3112_v28 = vmul.f32 %v3656_v6, %v3106_v17 }
 0xbaf   :  { %v3120_v40 = vadd.f32 %v3340_v18, %v3112_v28 }
 0xbb1   :  { %v3121_v33 = vpack.c.bf16 %v3120_v40, %v3119_v55 }
 0xbb3   :  { %3567 = vmatmul.mubr.msk.bf16.vlgmr.msra.gmra.mrb[52].mxu0 %vm123_vm0, %v3121_v33 }
 0xc86   :  { %v3182_v46 = vpop.f32.mrb[52].mxu0 }
 0xc87   :  { %v3183_v47 = vadd.f32 %v3341_v36, %v3182_v46  ;;  %v3568_v26 = vpop.f32.mrb[53].mxu0 }
 0xc88   :  { %v3185_v52 = vpop.f32.mrb[54].mxu0 }
 0xc89   :  { %v3186_v62 = vadd.f32 %v3341_v36, %v3185_v52  ;;  %v3569_v59 = vpop.f32.mrb[55].mxu0  ;;  %v3189_v20 = vmax.f32 %v3183_v47, 0.0 }
 0xc8b   :  { %v3190_v56 = vmax.f32 %v3186_v62, 0.0 }
 0xc8d   :  { %v3191_v23 = vpack.c.bf16 %v3190_v56, %v3189_v20 }
 0xc8f   :  { %3579 = vmatmul.mubr.msk.bf16.vlgmr.msra.gmra.mrb[48].mxu1 %vm3231_vm14, %v3191_v23 }
 0xd62   :  { %v3269_v24 = vpop.f32.mrb[48].mxu1 }
 0xd63   :  { %v3270_v4 = vadd.f32 %v3345_v15, %v3269_v24  ;;  %v3580_v27 = vpop.f32.mrb[49].mxu1 }
 0xd64   :  { %v3272_v12 = vpop.f32.mrb[50].mxu1 }
 0xd65   :  { %v3276_v5 = vadd.f32 %v3270_v4, %v4483_v44  ;;  %v3273_v32 = vadd.f32 %v3345_v15, %v3272_v12  ;;  %v3581_v58 = vpop.f32.mrb[51].mxu1 }
 0xd67   :  { %3278 = vst.msk [vmem:[#allocation13] sm:$0xff] %vm123_vm0, %v3276_v5  ;;  %v3277_v7 = vadd.f32 %v3273_v32, %v4527_v37 }
 0xd69   :  { %3279 = vst.msk [vmem:[#allocation13 + $0x8] sm:$0xff] %vm123_vm0, %v3277_v7 }
 0xd6a   :  { %3802 = shalt.err (!%p3799_p10)
}
 0xd6b   :  { %s3803_s20 = scalar_lea.hbm %s4593_s14, 256 }
 0xd6c   :  { %p3804_p11 = scmp.ne.s32.totalorder %s4593_s14, %s3803_s20  ;;  %p3807_p12 = scmp.lt.u32.totalorder %s3803_s20, %s4593_s14 }
 0xd6e   :  { %p3809_p13 = pnand %p3807_p12, %p3804_p11 }
 0xd70   :  { %3812 = shalt.err (!%p3809_p13)
}
 0xd71   :  { %s3840_s1 = smov 128   ;;  %s3841_s22 = smov 8  }
 0xd72   :  { %3291 = dma.vmem_to_hbm [thread:$0]  %s3286_s17, 256, %s4593_s14, [#allocation4], %s3840_s1, %s3840_s1, %s3841_s22  }
 0xd73   :  { %3821 = dma.done.wait [#allocation4], 256  }
 0xd74   :  { %3822 = vsyncadd [#allocation4], 4294967040 }
 0xd75   :  { %3295 = vsyncpa [#allocation3], 1 }
 0xd76   :  { %3296 = vsyncpa [#allocation6], 1 }
 0xd77   :  { %3297 = vsyncpa [#allocation9], 1 }
 0xd78   :  { %3298 = vsyncpa [#allocation12], 1 }
 0xd79   :  { %3299 = vsyncpa [#allocation4], 1 }

</bundles_post_ra>
